<compile_context>
chip_gen: v7x
topology: tpu7x:2x2x1
jax: 0.10.0
libtpu: 0.0.40
codegen_flags: <defaults>
</compile_context>

<pallas_src>
import functools

import jax
import jax.numpy as jnp
from jax.experimental import pallas as pl
from jax.experimental.pallas import tpu as pltpu


# ----------------------------------------------------------------------------
# Fused kernel: qkv 1x1 conv + 3x3 depthwise conv + channel attention + proj
# ----------------------------------------------------------------------------
def _fused_attention_kernel(
    x_ref,        # (1, C, HW)       input slab (channels-first, HW on lanes)
    wqkv_ref,     # (3C, C)          1x1 qkv conv weight
    bqkv_ref,     # (3C, 1)          1x1 qkv conv bias
    wdw_ref,      # (3C, 9)          depthwise 3x3 weight, tap = (dy+1)*3+(dx+1)
    bdw_ref,      # (3C, 1)          depthwise bias
    wproj_ref,    # (C, C)           project_out weight
    bproj_ref,    # (C, 1)           project_out bias
    t_ref,        # (num_heads,)     temperature, in SMEM
    o_ref,        # (1, C, HW)       output
    pad_ref,      # (3C, PAD+HW+PAD) VMEM scratch (halo-padded qkv row)
    *, C, num_heads, H, W, pad,
):
    HW = H * W
    C3 = 3 * C
    ch = C // num_heads

    # ---- 1x1 qkv conv: (3C, C) @ (C, HW) ------------------------------------
    x = x_ref[0]                                                  # (C, HW)
    qkv = jnp.dot(wqkv_ref[...], x, preferred_element_type=jnp.float32)
    qkv = qkv + bqkv_ref[...]                                     # (3C, HW)

    # ---- 3x3 depthwise conv (padding=1) on the flattened HW axis ------------
    # qkv sits in the middle of a zero-haloed scratch row; each tap is a static
    # lane-offset window read.  Out-of-image rows (dy) fall into the zero halo;
    # row-wrap along W (dx) is killed once per dx group by a column mask.
    pad_ref[:, :pad] = jnp.zeros((C3, pad), jnp.float32)
    pad_ref[:, pad:pad + HW] = qkv
    pad_ref[:, pad + HW:] = jnp.zeros((C3, pad), jnp.float32)

    lane = jax.lax.broadcasted_iota(jnp.int32, (1, HW), 1)
    xpos = lane % W
    # hoisted once (broadcast_in_dim is not CSE'd by JAX)
    mask_l = jnp.broadcast_to((xpos >= 1).astype(jnp.float32), (C3, HW))
    mask_r = jnp.broadcast_to((xpos <= W - 2).astype(jnp.float32), (C3, HW))

    acc = None
    for dx, mask in ((-1, mask_l), (0, None), (1, mask_r)):
        part = None
        for dy in (-1, 0, 1):
            off = dy * W + dx
            tap = (dy + 1) * 3 + (dx + 1)
            term = pad_ref[:, pad + off: pad + off + HW] * wdw_ref[:, tap:tap + 1]
            part = term if part is None else part + term
        if mask is not None:
            part = part * mask          # one mask multiply per dx group
        acc = part if acc is None else acc + part
    qkv_dw = acc + bdw_ref[...]                                   # (3C, HW)

    # ---- channel attention (all heads in one MXU matmul) ---------------------
    q_all = qkv_dw[:C, :]                                         # (C, HW)
    k_all = qkv_dw[C:2 * C, :]
    v_all = qkv_dw[2 * C:, :]

    # x / max(||x||, eps)  ==  x * rsqrt(max(||x||^2, eps^2)); torch eps=1e-12
    eps_sq = 1e-24
    qn = q_all * jax.lax.rsqrt(
        jnp.maximum(jnp.sum(q_all * q_all, axis=-1, keepdims=True), eps_sq))
    kn = k_all * jax.lax.rsqrt(
        jnp.maximum(jnp.sum(k_all * k_all, axis=-1, keepdims=True), eps_sq))

    # Single (C, HW) x (HW, C) matmul; per-head attention matrices are the
    # 8-aligned diagonal blocks.  Contract last axes (no explicit transpose).
    gram = jax.lax.dot_general(
        qn, kn, dimension_numbers=(((1,), (1,)), ((), ())),
        preferred_element_type=jnp.float32)                       # (C, C)

    outs = []
    for h in range(num_heads):
        s = h * ch
        a = gram[s:s + ch, s:s + ch] * t_ref[h]                   # SMEM scalar
        a = a - jnp.max(a, axis=-1, keepdims=True)
        a = jnp.exp(a)
        # exact division (approx reciprocal would risk the 1e-4 check)
        a = a / jnp.sum(a, axis=-1, keepdims=True)
        outs.append(jnp.dot(a, v_all[s:s + ch, :],
                            preferred_element_type=jnp.float32))
    out = outs[0] if num_heads == 1 else jnp.concatenate(outs, axis=0)  # (C, HW)

    # ---- project_out 1x1 conv (lane-dense store) -----------------------------
    o = jnp.dot(wproj_ref[...], out, preferred_element_type=jnp.float32)
    o_ref[0] = o + bproj_ref[...]


# ----------------------------------------------------------------------------
# Wrapper (only free reshapes outside the kernel — no transposes, no pads)
# ----------------------------------------------------------------------------
@functools.partial(jax.jit, static_argnames=("num_heads",))
def attention_forward(x_nchw, params, num_heads):
    B, C, H, W = x_nchw.shape
    HW = H * W
    C3 = 3 * C
    # halo width (lanes) on each side of the flattened HW axis; must be >= W+1;
    # multiple of 128 keeps the interior scratch writes lane-aligned.
    PAD = ((W + 1 + 127) // 128) * 128

    x = x_nchw.reshape(B, C, HW)                 # free reshape (no transpose)
    w_dw = params["w_dw"].reshape(C3, 9)
    b_qkv = params["b_qkv"].reshape(C3, 1)
    b_dw = params["b_dw"].reshape(C3, 1)
    b_proj = params["b_proj"].reshape(C, 1)
    temp = params["temperature"].reshape(num_heads)

    kernel = functools.partial(
        _fused_attention_kernel, C=C, num_heads=num_heads, H=H, W=W, pad=PAD)

    out = pl.pallas_call(
        kernel,
        out_shape=jax.ShapeDtypeStruct((B, C, HW), jnp.float32),
        grid=(B,),
        in_specs=[
            pl.BlockSpec((1, C, HW), lambda b: (b, 0, 0)),          # x
            pl.BlockSpec((C3, C), lambda b: (0, 0)),                # w_qkv
            pl.BlockSpec((C3, 1), lambda b: (0, 0)),                # b_qkv
            pl.BlockSpec((C3, 9), lambda b: (0, 0)),                # w_dw
            pl.BlockSpec((C3, 1), lambda b: (0, 0)),                # b_dw
            pl.BlockSpec((C, C), lambda b: (0, 0)),                 # w_proj
            pl.BlockSpec((C, 1), lambda b: (0, 0)),                 # b_proj
            pl.BlockSpec(memory_space=pltpu.MemorySpace.SMEM),      # temperature
        ],
        out_specs=pl.BlockSpec((1, C, HW), lambda b: (b, 0, 0)),
        scratch_shapes=[pltpu.VMEM((C3, HW + 2 * PAD), jnp.float32)],
        compiler_params=pltpu.CompilerParams(
            dimension_semantics=("parallel",)),
    )(x, params["w_qkv"], b_qkv, w_dw, b_dw,
      params["w_proj"], b_proj, temp)

    return out.reshape(B, C, H, W)


# ----------------------------------------------------------------------------
# Pure-JAX reference (mirrors the PyTorch module), for verification
# ----------------------------------------------------------------------------
def reference_forward(x, params, num_heads):
    B, C, H, W = x.shape
    qkv = (jnp.einsum("oc,bchw->bohw", params["w_qkv"], x)
           + params["b_qkv"][None, :, None, None])
    xp = jnp.pad(qkv, ((0, 0), (0, 0), (1, 1), (1, 1)))
    acc = jnp.zeros_like(qkv)
    for ky in range(3):
        for kx in range(3):
            acc = acc + xp[:, :, ky:ky + H, kx:kx + W] * \
                params["w_dw"][:, ky, kx][None, :, None, None]
    qkv = acc + params["b_dw"][None, :, None, None]
    q, k, v = jnp.split(qkv, 3, axis=1)
    ch = C // num_heads
    q = q.reshape(B, num_heads, ch, H * W)
    k = k.reshape(B, num_heads, ch, H * W)
    v = v.reshape(B, num_heads, ch, H * W)
    qn = q / jnp.maximum(jnp.linalg.norm(q, axis=-1, keepdims=True), 1e-12)
    kn = k / jnp.maximum(jnp.linalg.norm(k, axis=-1, keepdims=True), 1e-12)
    attn = jnp.einsum("bhcn,bhdn->bhcd", qn, kn) * \
        params["temperature"].reshape(1, num_heads, 1, 1)
    attn = jax.nn.softmax(attn, axis=-1)
    o = jnp.einsum("bhcd,bhdn->bhcn", attn, v).reshape(B, C, H, W)
    o = (jnp.einsum("oc,bchw->bohw", params["w_proj"], o)
         + params["b_proj"][None, :, None, None])
    return o


# ----------------------------------------------------------------------------
if __name__ == "__main__":
    dim = 16
    num_heads = 2
    B, H, W = 2, 16, 16

    key = jax.random.PRNGKey(0)
    ks = jax.random.split(key, 8)

    # Conv weights stored in PyTorch orientation (out_channels first); the
    # depthwise weight is (3C, 3, 3) (squeezed groups=3C conv weight).
    params = {
        "w_qkv": 0.1 * jax.random.normal(ks[0], (3 * dim, dim), jnp.float32),
        "b_qkv": 0.1 * jax.random.normal(ks[1], (3 * dim,), jnp.float32),
        "w_dw": 0.1 * jax.random.normal(ks[2], (3 * dim, 3, 3), jnp.float32),
        "b_dw": 0.1 * jax.random.normal(ks[3], (3 * dim,), jnp.float32),
        "w_proj": 0.1 * jax.random.normal(ks[4], (dim, dim), jnp.float32),
        "b_proj": 0.1 * jax.random.normal(ks[5], (dim,), jnp.float32),
        "temperature": 1.0 + 0.1 * jax.random.normal(
            ks[6], (num_heads, 1, 1), jnp.float32),
    }

    x = jax.random.normal(ks[7], (B, dim, H, W), jnp.float32)

    out = jax.block_until_ready(attention_forward(x, params, num_heads))
    ref = jax.block_until_ready(reference_forward(x, params, num_heads))

    assert out.shape == (B, dim, H, W)
    max_err = float(jnp.max(jnp.abs(out - ref)))
    assert jnp.allclose(out, ref, rtol=1e-4, atol=1e-4), max_err
    print("KERNEL_OK")
</pallas_src>

<mosaic_0001>
module attributes {stable_mosaic.version = 11 : i64} {
  func.func @_fused_attention_kernel(%arg0: i32, %arg1: memref<1x16x256xf32, #tpu.memory_space<vmem>>, %arg2: memref<48x16xf32, #tpu.memory_space<vmem>>, %arg3: memref<48x1xf32, #tpu.memory_space<vmem>>, %arg4: memref<48x9xf32, #tpu.memory_space<vmem>>, %arg5: memref<48x1xf32, #tpu.memory_space<vmem>>, %arg6: memref<16x16xf32, #tpu.memory_space<vmem>>, %arg7: memref<16x1xf32, #tpu.memory_space<vmem>>, %arg8: memref<2xf32, #tpu.memory_space<smem>>, %arg9: memref<1x16x256xf32, #tpu.memory_space<vmem>>, %arg10: memref<48x512xf32, #tpu.memory_space<vmem>>) attributes {dimension_semantics = [#tpu.dimension_semantics<parallel>], iteration_bounds = array<i64: 2>, scalar_prefetch = 0 : i64, scratch_operands = 1 : i64, tpu.core_type = #tpu.core_type<tc>, window_params = [{transform_indices = @transform_0, window_bounds = array<i64: 1, 16, 256>}, {pipeline_mode = #tpu.pipeline_mode<synchronous>, transform_indices = @transform_1, window_bounds = array<i64: 48, 16>}, {pipeline_mode = #tpu.pipeline_mode<synchronous>, transform_indices = @transform_2, window_bounds = array<i64: 48, 1>}, {pipeline_mode = #tpu.pipeline_mode<synchronous>, transform_indices = @transform_3, window_bounds = array<i64: 48, 9>}, {pipeline_mode = #tpu.pipeline_mode<synchronous>, transform_indices = @transform_4, window_bounds = array<i64: 48, 1>}, {pipeline_mode = #tpu.pipeline_mode<synchronous>, transform_indices = @transform_5, window_bounds = array<i64: 16, 16>}, {pipeline_mode = #tpu.pipeline_mode<synchronous>, transform_indices = @transform_6, window_bounds = array<i64: 16, 1>}, {transform_indices = @transform_7, window_bounds = array<i64: 2>}, {transform_indices = @transform_8, window_bounds = array<i64: 1, 16, 256>}]} {
    %c0 = arith.constant 0 : index
    %c0_0 = arith.constant 0 : index
    %c0_1 = arith.constant 0 : index
    %0 = vector.load %arg1[%c0, %c0_0, %c0_1] : memref<1x16x256xf32, #tpu.memory_space<vmem>>, vector<1x16x256xf32>
    %1 = vector.shape_cast %0 : vector<1x16x256xf32> to vector<16x256xf32>
    %c0_2 = arith.constant 0 : index
    %c0_3 = arith.constant 0 : index
    %2 = vector.load %arg2[%c0_2, %c0_3] : memref<48x16xf32, #tpu.memory_space<vmem>>, vector<48x16xf32>
    %cst = arith.constant dense<0.000000e+00> : vector<48x256xf32>
    %3 = tpu.matmul %2, %1, %cst {dimension_numbers = #tpu.dot_dimension_numbers<[1], [0], [0], [1], [0, 0, 1, 1], [], []>} : vector<48x16xf32>, vector<16x256xf32>, vector<48x256xf32> -> vector<48x256xf32>
    %c0_4 = arith.constant 0 : index
    %c0_5 = arith.constant 0 : index
    %4 = vector.load %arg3[%c0_4, %c0_5] : memref<48x1xf32, #tpu.memory_space<vmem>>, vector<48x1xf32>
    %5 = vector.broadcast %4 : vector<48x1xf32> to vector<48x256xf32>
    %6 = arith.addf %3, %5 : vector<48x256xf32>
    %cst_6 = arith.constant 0.000000e+00 : f32
    %7 = vector.broadcast %cst_6 : f32 to vector<48x128xf32>
    %c0_7 = arith.constant 0 : index
    %c0_8 = arith.constant 0 : index
    %8 = vector.load %arg10[%c0_7, %c0_8] : memref<48x512xf32, #tpu.memory_space<vmem>>, vector<48x128xf32>
    tpu.vector_store %arg10[%c0_7, %c0_8], %7 {strides = array<i32>} : memref<48x512xf32, #tpu.memory_space<vmem>>, vector<48x128xf32>,
    %c0_9 = arith.constant 0 : index
    %c128 = arith.constant 128 : index
    %9 = vector.load %arg10[%c0_9, %c128] : memref<48x512xf32, #tpu.memory_space<vmem>>, vector<48x256xf32>
    tpu.vector_store %arg10[%c0_9, %c128], %6 {strides = array<i32>} : memref<48x512xf32, #tpu.memory_space<vmem>>, vector<48x256xf32>,
    %cst_10 = arith.constant 0.000000e+00 : f32
    %10 = vector.broadcast %cst_10 : f32 to vector<48x128xf32>
    %c0_11 = arith.constant 0 : index
    %c384 = arith.constant 384 : index
    %11 = vector.load %arg10[%c0_11, %c384] : memref<48x512xf32, #tpu.memory_space<vmem>>, vector<48x128xf32>
    tpu.vector_store %arg10[%c0_11, %c384], %10 {strides = array<i32>} : memref<48x512xf32, #tpu.memory_space<vmem>>, vector<48x128xf32>,
    %12 = tpu.iota {dimensions = array<i32: 1>} : vector<1x256xi32>
    %c16_i32 = arith.constant 16 : i32
    %c0_i32 = arith.constant 0 : i32
    %13 = arith.cmpi eq, %c16_i32, %c0_i32 : i32
    %c1_i32 = arith.constant 1 : i32
    %14 = arith.select %13, %c1_i32, %c16_i32 : i32
    %15 = vector.broadcast %14 : i32 to vector<1x256xi32>
    %16 = arith.remsi %12, %15 : vector<1x256xi32>
    %c0_i32_12 = arith.constant 0 : i32
    %17 = vector.broadcast %c0_i32_12 : i32 to vector<1x256xi32>
    %18 = arith.cmpi ne, %16, %17 : vector<1x256xi32>
    %c0_i32_13 = arith.constant 0 : i32
    %19 = vector.broadcast %c0_i32_13 : i32 to vector<1x256xi32>
    %20 = arith.cmpi slt, %16, %19 : vector<1x256xi32>
    %c0_i32_14 = arith.constant 0 : i32
    %21 = arith.cmpi slt, %14, %c0_i32_14 : i32
    %22 = vector.broadcast %21 : i1 to vector<1x256xi1>
    %23 = vector.broadcast %22 : vector<1x256xi1> to vector<1x256xi1>
    %24 = arith.xori %20, %23 : vector<1x256xi1>
    %25 = arith.andi %24, %18 : vector<1x256xi1>
    %26 = vector.broadcast %14 : i32 to vector<1x256xi32>
    %27 = arith.addi %16, %26 : vector<1x256xi32>
    %28 = arith.select %25, %27, %16 : vector<1x256xi1>, vector<1x256xi32>
    %c1_i32_15 = arith.constant 1 : i32
    %29 = vector.broadcast %c1_i32_15 : i32 to vector<1x256xi32>
    %30 = arith.cmpi sge, %28, %29 : vector<1x256xi32>
    %31 = arith.extui %30 : vector<1x256xi1> to vector<1x256xi32>
    %32 = arith.sitofp %31 : vector<1x256xi32> to vector<1x256xf32>
    %33 = vector.shape_cast %32 : vector<1x256xf32> to vector<1x256xf32>
    %34 = vector.broadcast %33 : vector<1x256xf32> to vector<48x256xf32>
    %c14_i32 = arith.constant 14 : i32
    %35 = vector.broadcast %c14_i32 : i32 to vector<1x256xi32>
    %36 = arith.cmpi sle, %28, %35 : vector<1x256xi32>
    %37 = arith.extui %36 : vector<1x256xi1> to vector<1x256xi32>
    %38 = arith.sitofp %37 : vector<1x256xi32> to vector<1x256xf32>
    %39 = vector.shape_cast %38 : vector<1x256xf32> to vector<1x256xf32>
    %40 = vector.broadcast %39 : vector<1x256xf32> to vector<48x256xf32>
    %c0_16 = arith.constant 0 : index
    %c111 = arith.constant 111 : index
    %41 = vector.load %arg10[%c0_16, %c111] : memref<48x512xf32, #tpu.memory_space<vmem>>, vector<48x256xf32>
    %c0_17 = arith.constant 0 : index
    %c0_18 = arith.constant 0 : index
    %42 = vector.load %arg4[%c0_17, %c0_18] : memref<48x9xf32, #tpu.memory_space<vmem>>, vector<48x1xf32>
    %43 = vector.broadcast %42 : vector<48x1xf32> to vector<48x256xf32>
    %44 = arith.mulf %41, %43 : vector<48x256xf32>
    %c0_19 = arith.constant 0 : index
    %c127 = arith.constant 127 : index
    %45 = vector.load %arg10[%c0_19, %c127] : memref<48x512xf32, #tpu.memory_space<vmem>>, vector<48x256xf32>
    %c0_20 = arith.constant 0 : index
    %c3 = arith.constant 3 : index
    %46 = vector.load %arg4[%c0_20, %c3] : memref<48x9xf32, #tpu.memory_space<vmem>>, vector<48x1xf32>
    %47 = vector.broadcast %46 : vector<48x1xf32> to vector<48x256xf32>
    %48 = arith.mulf %45, %47 : vector<48x256xf32>
    %49 = arith.addf %44, %48 : vector<48x256xf32>
    %c0_21 = arith.constant 0 : index
    %c143 = arith.constant 143 : index
    %50 = vector.load %arg10[%c0_21, %c143] : memref<48x512xf32, #tpu.memory_space<vmem>>, vector<48x256xf32>
    %c0_22 = arith.constant 0 : index
    %c6 = arith.constant 6 : index
    %51 = vector.load %arg4[%c0_22, %c6] : memref<48x9xf32, #tpu.memory_space<vmem>>, vector<48x1xf32>
    %52 = vector.broadcast %51 : vector<48x1xf32> to vector<48x256xf32>
    %53 = arith.mulf %50, %52 : vector<48x256xf32>
    %54 = arith.addf %49, %53 : vector<48x256xf32>
    %55 = arith.mulf %54, %34 : vector<48x256xf32>
    %c0_23 = arith.constant 0 : index
    %c112 = arith.constant 112 : index
    %56 = vector.load %arg10[%c0_23, %c112] : memref<48x512xf32, #tpu.memory_space<vmem>>, vector<48x256xf32>
    %c0_24 = arith.constant 0 : index
    %c1 = arith.constant 1 : index
    %57 = vector.load %arg4[%c0_24, %c1] : memref<48x9xf32, #tpu.memory_space<vmem>>, vector<48x1xf32>
    %58 = vector.broadcast %57 : vector<48x1xf32> to vector<48x256xf32>
    %59 = arith.mulf %56, %58 : vector<48x256xf32>
    %c0_25 = arith.constant 0 : index
    %c128_26 = arith.constant 128 : index
    %60 = vector.load %arg10[%c0_25, %c128_26] : memref<48x512xf32, #tpu.memory_space<vmem>>, vector<48x256xf32>
    %c0_27 = arith.constant 0 : index
    %c4 = arith.constant 4 : index
    %61 = vector.load %arg4[%c0_27, %c4] : memref<48x9xf32, #tpu.memory_space<vmem>>, vector<48x1xf32>
    %62 = vector.broadcast %61 : vector<48x1xf32> to vector<48x256xf32>
    %63 = arith.mulf %60, %62 : vector<48x256xf32>
    %64 = arith.addf %59, %63 : vector<48x256xf32>
    %c0_28 = arith.constant 0 : index
    %c144 = arith.constant 144 : index
    %65 = vector.load %arg10[%c0_28, %c144] : memref<48x512xf32, #tpu.memory_space<vmem>>, vector<48x256xf32>
    %c0_29 = arith.constant 0 : index
    %c7 = arith.constant 7 : index
    %66 = vector.load %arg4[%c0_29, %c7] : memref<48x9xf32, #tpu.memory_space<vmem>>, vector<48x1xf32>
    %67 = vector.broadcast %66 : vector<48x1xf32> to vector<48x256xf32>
    %68 = arith.mulf %65, %67 : vector<48x256xf32>
    %69 = arith.addf %64, %68 : vector<48x256xf32>
    %70 = arith.addf %55, %69 : vector<48x256xf32>
    %c0_30 = arith.constant 0 : index
    %c113 = arith.constant 113 : index
    %71 = vector.load %arg10[%c0_30, %c113] : memref<48x512xf32, #tpu.memory_space<vmem>>, vector<48x256xf32>
    %c0_31 = arith.constant 0 : index
    %c2 = arith.constant 2 : index
    %72 = vector.load %arg4[%c0_31, %c2] : memref<48x9xf32, #tpu.memory_space<vmem>>, vector<48x1xf32>
    %73 = vector.broadcast %72 : vector<48x1xf32> to vector<48x256xf32>
    %74 = arith.mulf %71, %73 : vector<48x256xf32>
    %c0_32 = arith.constant 0 : index
    %c129 = arith.constant 129 : index
    %75 = vector.load %arg10[%c0_32, %c129] : memref<48x512xf32, #tpu.memory_space<vmem>>, vector<48x256xf32>
    %c0_33 = arith.constant 0 : index
    %c5 = arith.constant 5 : index
    %76 = vector.load %arg4[%c0_33, %c5] : memref<48x9xf32, #tpu.memory_space<vmem>>, vector<48x1xf32>
    %77 = vector.broadcast %76 : vector<48x1xf32> to vector<48x256xf32>
    %78 = arith.mulf %75, %77 : vector<48x256xf32>
    %79 = arith.addf %74, %78 : vector<48x256xf32>
    %c0_34 = arith.constant 0 : index
    %c145 = arith.constant 145 : index
    %80 = vector.load %arg10[%c0_34, %c145] : memref<48x512xf32, #tpu.memory_space<vmem>>, vector<48x256xf32>
    %c0_35 = arith.constant 0 : index
    %c8 = arith.constant 8 : index
    %81 = vector.load %arg4[%c0_35, %c8] : memref<48x9xf32, #tpu.memory_space<vmem>>, vector<48x1xf32>
    %82 = vector.broadcast %81 : vector<48x1xf32> to vector<48x256xf32>
    %83 = arith.mulf %80, %82 : vector<48x256xf32>
    %84 = arith.addf %79, %83 : vector<48x256xf32>
    %85 = arith.mulf %84, %40 : vector<48x256xf32>
    %86 = arith.addf %70, %85 : vector<48x256xf32>
    %c0_36 = arith.constant 0 : index
    %c0_37 = arith.constant 0 : index
    %87 = vector.load %arg5[%c0_36, %c0_37] : memref<48x1xf32, #tpu.memory_space<vmem>>, vector<48x1xf32>
    %88 = vector.broadcast %87 : vector<48x1xf32> to vector<48x256xf32>
    %89 = arith.addf %86, %88 : vector<48x256xf32>
    %90 = vector.extract_strided_slice %89 {offsets = [0, 0], sizes = [16, 256], strides = [1, 1]} : vector<48x256xf32> to vector<16x256xf32>
    %91 = vector.extract_strided_slice %89 {offsets = [16, 0], sizes = [16, 256], strides = [1, 1]} : vector<48x256xf32> to vector<16x256xf32>
    %92 = vector.extract_strided_slice %89 {offsets = [32, 0], sizes = [16, 256], strides = [1, 1]} : vector<48x256xf32> to vector<16x256xf32>
    %93 = arith.mulf %90, %90 : vector<16x256xf32>
    %cst_38 = arith.constant dense<0.000000e+00> : vector<16xf32>
    %94 = vector.multi_reduction <add>, %93, %cst_38 [1] : vector<16x256xf32> to vector<16xf32>
    %95 = vector.shape_cast %94 : vector<16xf32> to vector<16x1xf32>
    %cst_39 = arith.constant 1.000000e-24 : f32
    %96 = vector.broadcast %cst_39 : f32 to vector<16x1xf32>
    %97 = arith.maximumf %95, %96 : vector<16x1xf32>
    %98 = math.rsqrt %97 : vector<16x1xf32>
    %99 = vector.broadcast %98 : vector<16x1xf32> to vector<16x256xf32>
    %100 = arith.mulf %90, %99 : vector<16x256xf32>
    %101 = arith.mulf %91, %91 : vector<16x256xf32>
    %cst_40 = arith.constant dense<0.000000e+00> : vector<16xf32>
    %102 = vector.multi_reduction <add>, %101, %cst_40 [1] : vector<16x256xf32> to vector<16xf32>
    %103 = vector.shape_cast %102 : vector<16xf32> to vector<16x1xf32>
    %cst_41 = arith.constant 1.000000e-24 : f32
    %104 = vector.broadcast %cst_41 : f32 to vector<16x1xf32>
    %105 = arith.maximumf %103, %104 : vector<16x1xf32>
    %106 = math.rsqrt %105 : vector<16x1xf32>
    %107 = vector.broadcast %106 : vector<16x1xf32> to vector<16x256xf32>
    %108 = arith.mulf %91, %107 : vector<16x256xf32>
    %cst_42 = arith.constant dense<0.000000e+00> : vector<16x16xf32>
    %109 = tpu.matmul %100, %108, %cst_42 {dimension_numbers = #tpu.dot_dimension_numbers<[1], [1], [0], [0], [0, 0, 1, 0], [], []>} : vector<16x256xf32>, vector<16x256xf32>, vector<16x16xf32> -> vector<16x16xf32>
    %110 = vector.extract_strided_slice %109 {offsets = [0, 0], sizes = [8, 8], strides = [1, 1]} : vector<16x16xf32> to vector<8x8xf32>
    %c0_43 = arith.constant 0 : index
    %111 = memref.load %arg8[%c0_43] : memref<2xf32, #tpu.memory_space<smem>>
    %112 = vector.broadcast %111 : f32 to vector<8x8xf32>
    %113 = arith.mulf %110, %112 : vector<8x8xf32>
    %cst_44 = arith.constant dense<0xFF800000> : vector<8xf32>
    %114 = vector.multi_reduction <maximumf>, %113, %cst_44 [1] : vector<8x8xf32> to vector<8xf32>
    %115 = vector.shape_cast %114 : vector<8xf32> to vector<8x1xf32>
    %116 = vector.broadcast %115 : vector<8x1xf32> to vector<8x8xf32>
    %117 = arith.subf %113, %116 : vector<8x8xf32>
    %118 = math.exp %117 : vector<8x8xf32>
    %cst_45 = arith.constant dense<0.000000e+00> : vector<8xf32>
    %119 = vector.multi_reduction <add>, %118, %cst_45 [1] : vector<8x8xf32> to vector<8xf32>
    %120 = vector.shape_cast %119 : vector<8xf32> to vector<8x1xf32>
    %121 = vector.broadcast %120 : vector<8x1xf32> to vector<8x8xf32>
    %122 = arith.divf %118, %121 : vector<8x8xf32>
    %123 = vector.extract_strided_slice %92 {offsets = [0, 0], sizes = [8, 256], strides = [1, 1]} : vector<16x256xf32> to vector<8x256xf32>
    %cst_46 = arith.constant dense<0.000000e+00> : vector<8x256xf32>
    %124 = tpu.matmul %122, %123, %cst_46 {dimension_numbers = #tpu.dot_dimension_numbers<[1], [0], [0], [1], [0, 0, 1, 1], [], []>} : vector<8x8xf32>, vector<8x256xf32>, vector<8x256xf32> -> vector<8x256xf32>
    %125 = vector.extract_strided_slice %109 {offsets = [8, 8], sizes = [8, 8], strides = [1, 1]} : vector<16x16xf32> to vector<8x8xf32>
    %c1_47 = arith.constant 1 : index
    %126 = memref.load %arg8[%c1_47] : memref<2xf32, #tpu.memory_space<smem>>
    %127 = vector.broadcast %126 : f32 to vector<8x8xf32>
    %128 = arith.mulf %125, %127 : vector<8x8xf32>
    %cst_48 = arith.constant dense<0xFF800000> : vector<8xf32>
    %129 = vector.multi_reduction <maximumf>, %128, %cst_48 [1] : vector<8x8xf32> to vector<8xf32>
    %130 = vector.shape_cast %129 : vector<8xf32> to vector<8x1xf32>
    %131 = vector.broadcast %130 : vector<8x1xf32> to vector<8x8xf32>
    %132 = arith.subf %128, %131 : vector<8x8xf32>
    %133 = math.exp %132 : vector<8x8xf32>
    %cst_49 = arith.constant dense<0.000000e+00> : vector<8xf32>
    %134 = vector.multi_reduction <add>, %133, %cst_49 [1] : vector<8x8xf32> to vector<8xf32>
    %135 = vector.shape_cast %134 : vector<8xf32> to vector<8x1xf32>
    %136 = vector.broadcast %135 : vector<8x1xf32> to vector<8x8xf32>
    %137 = arith.divf %133, %136 : vector<8x8xf32>
    %138 = vector.extract_strided_slice %92 {offsets = [8, 0], sizes = [8, 256], strides = [1, 1]} : vector<16x256xf32> to vector<8x256xf32>
    %cst_50 = arith.constant dense<0.000000e+00> : vector<8x256xf32>
    %139 = tpu.matmul %137, %138, %cst_50 {dimension_numbers = #tpu.dot_dimension_numbers<[1], [0], [0], [1], [0, 0, 1, 1], [], []>} : vector<8x8xf32>, vector<8x256xf32>, vector<8x256xf32> -> vector<8x256xf32>
    %140 = tpu.concatenate %124, %139 in 0 : vector<8x256xf32>, vector<8x256xf32> -> vector<16x256xf32>
    %c0_51 = arith.constant 0 : index
    %c0_52 = arith.constant 0 : index
    %141 = vector.load %arg6[%c0_51, %c0_52] : memref<16x16xf32, #tpu.memory_space<vmem>>, vector<16x16xf32>
    %cst_53 = arith.constant dense<0.000000e+00> : vector<16x256xf32>
    %142 = tpu.matmul %141, %140, %cst_53 {dimension_numbers = #tpu.dot_dimension_numbers<[1], [0], [0], [1], [0, 0, 1, 1], [], []>} : vector<16x16xf32>, vector<16x256xf32>, vector<16x256xf32> -> vector<16x256xf32>
    %c0_54 = arith.constant 0 : index
    %c0_55 = arith.constant 0 : index
    %143 = vector.load %arg7[%c0_54, %c0_55] : memref<16x1xf32, #tpu.memory_space<vmem>>, vector<16x1xf32>
    %144 = vector.broadcast %143 : vector<16x1xf32> to vector<16x256xf32>
    %145 = arith.addf %142, %144 : vector<16x256xf32>
    %c0_56 = arith.constant 0 : index
    %c0_57 = arith.constant 0 : index
    %c0_58 = arith.constant 0 : index
    %146 = vector.load %arg9[%c0_56, %c0_57, %c0_58] : memref<1x16x256xf32, #tpu.memory_space<vmem>>, vector<1x16x256xf32>
    %147 = vector.shape_cast %146 : vector<1x16x256xf32> to vector<16x256xf32>
    %148 = vector.shape_cast %145 : vector<16x256xf32> to vector<1x16x256xf32>
    tpu.vector_store %arg9[%c0_56, %c0_57, %c0_58], %148 {strides = array<i32>} : memref<1x16x256xf32, #tpu.memory_space<vmem>>, vector<1x16x256xf32>,
    return
  }
  func.func @transform_0(%arg0: i32) -> (i32, i32, i32) {
    %c0_i32 = arith.constant 0 : i32
    %c0_i32_0 = arith.constant 0 : i32
    %c0_i32_1 = arith.constant 0 : i32
    return %arg0, %c0_i32, %c0_i32_0 : i32, i32, i32
  }
  func.func @transform_1(%arg0: i32) -> (i32, i32) {
    %c0_i32 = arith.constant 0 : i32
    %c0_i32_0 = arith.constant 0 : i32
    %c0_i32_1 = arith.constant 0 : i32
    return %c0_i32, %c0_i32_0 : i32, i32
  }
  func.func @transform_2(%arg0: i32) -> (i32, i32) {
    %c0_i32 = arith.constant 0 : i32
    %c0_i32_0 = arith.constant 0 : i32
    %c0_i32_1 = arith.constant 0 : i32
    return %c0_i32, %c0_i32_0 : i32, i32
  }
  func.func @transform_3(%arg0: i32) -> (i32, i32) {
    %c0_i32 = arith.constant 0 : i32
    %c0_i32_0 = arith.constant 0 : i32
    %c0_i32_1 = arith.constant 0 : i32
    return %c0_i32, %c0_i32_0 : i32, i32
  }
  func.func @transform_4(%arg0: i32) -> (i32, i32) {
    %c0_i32 = arith.constant 0 : i32
    %c0_i32_0 = arith.constant 0 : i32
    %c0_i32_1 = arith.constant 0 : i32
    return %c0_i32, %c0_i32_0 : i32, i32
  }
  func.func @transform_5(%arg0: i32) -> (i32, i32) {
    %c0_i32 = arith.constant 0 : i32
    %c0_i32_0 = arith.constant 0 : i32
    %c0_i32_1 = arith.constant 0 : i32
    return %c0_i32, %c0_i32_0 : i32, i32
  }
  func.func @transform_6(%arg0: i32) -> (i32, i32) {
    %c0_i32 = arith.constant 0 : i32
    %c0_i32_0 = arith.constant 0 : i32
    %c0_i32_1 = arith.constant 0 : i32
    return %c0_i32, %c0_i32_0 : i32, i32
  }
  func.func @transform_7(%arg0: i32) -> i32 {
    %c0_i32 = arith.constant 0 : i32
    %c0_i32_0 = arith.constant 0 : i32
    return %c0_i32 : i32
  }
  func.func @transform_8(%arg0: i32) -> (i32, i32, i32) {
    %c0_i32 = arith.constant 0 : i32
    %c0_i32_0 = arith.constant 0 : i32
    %c0_i32_1 = arith.constant 0 : i32
    return %arg0, %c0_i32, %c0_i32_0 : i32, i32, i32
  }
}

</mosaic_0001>

<bundles_post_ra>
// kernel: attention_forward.1
= control target key start
LH: loop header
LB: loop body
LE: loop exit
PB: predicated region body
PF: predicated region fallthrough
CT: control target
= control target key end

     0   :  { %13 = vsyncpa [#allocation4], 0  ;;  %s2752_s27 = smov 0   ;;  %s4016_s0 = inlined_call_operand.vmem [shape: f32[2,16,256], index: 0, kind: input, shape index: {}]   ;;  %s4017_s1 = inlined_call_operand.vmem [shape: f32[48,16], index: 1, kind: input, shape index: {}]   ;;  %s4018_s2 = inlined_call_operand.vmem [shape: f32[48,1], index: 2, kind: input, shape index: {}]   ;;  %s4019_s3 = inlined_call_operand.vmem [shape: f32[48,9], index: 3, kind: input, shape index: {}]   ;;  %s4020_s4 = inlined_call_operand.vmem [shape: f32[48,1], index: 4, kind: input, shape index: {}]   ;;  %s4021_s5 = inlined_call_operand.vmem [shape: f32[16,16], index: 5, kind: input, shape index: {}]   ;;  %s4022_s6 = inlined_call_operand.vmem [shape: f32[16,1], index: 6, kind: input, shape index: {}]   ;;  %s4023_s7 = inlined_call_operand.vmem [shape: f32[2], index: 7, kind: input, shape index: {}]   ;;  %s4024_s8 = inlined_call_operand.vmem [shape: f32[2,16,256], index: 8, kind: output, shape index: {}]  }
   0x1 LB: > { %s2758_s28 = sadd.s32 4294967295, %s2686_s27   ;;  %p2481_p0 = scmp.ge.s32.totalorder %s2686_s27, 1  ;;  %s2686_s27 = sphi %s2752_s27, %s19_s27  }
   0x2   : > { %p223_p1 = scmp.lt.s32.totalorder %s2686_s27, 3  ;;  %s254_s9 = sshll.u32 %s4023_s7, 4  ;;  %s255_s9 = int_to_ptr.vmem [resolvable:$true] %s254_s9 }
   0x3   : > { %p2529_p3 = scmp.eq.s32.totalorder %s2758_s28, 0  ;;  %s2661_s11 = scalar_lea.vmem %s255_s9, 16 }
   0x4   : > { %p2765_p2 = pnand %p2481_p0, %p223_p1  ;;  %p2662_p6 = scmp.ne.s32.totalorder %s255_s9, %s2661_s11 }
   0x5   : > { %p2669_p10 = scmp.lt.s32.totalorder %s255_s9, %s255_s9  ;;  %p2670_p11 = scmp.lt.s32.totalorder %s2661_s11, %s2661_s11 }
   0x6   : > { %p2525_p4 = pneg %p2765_p2 }
   0x7   : > { %p2671_p12 = por %p2670_p11, %p2669_p10 }
   0x8   : > { %p2526_p5 = pnand %p2529_p3, %p2525_p4 }
   0xa   : > { %p2663_p7 = pneg %p2526_p5 }
   0xc   : > { %p2664_p8 = pnand %p2663_p7, %p2662_p6 }
   0xe   : > { %p2665_p9 = pneg %p2664_p8 }
  0x10   : > { %p2672_p13 = pnand %p2671_p12, %p2665_p9 }
  0x12   : > { %2675 = shalt.err (!%p2672_p13)
}
  0x13   : > { %s2688_s12 = smov [#allocation3]   ;;  %275 = sbr.rel (%p2765_p2) target bundleno = 2210 (0x8a2), region = 52 }
  0x14   : > { %2528 = dma.vmem_to_smem (!%p2526_p5), %s255_s9, 16, %s2688_s12, [#allocation4]  }
  0x1a   : > { %2681 = dma.done.wait (%p2529_p3), [#allocation4], 16  }
  0x1b   : > { %2683 = vsyncadd (%p2529_p3), [#allocation4], 4294967280 }
  0x1c   : > { %281 = sfence }
  0x1d   : > { %v2783_v0 = vld [vmem:[%s4019_s3 + $0x10] sm:$0xff]  ;;  %p310_p0 = scmp.lt.s32.totalorder %s2758_s28, 1  ;;  %v4040_v1 = vmov 4   ;;  %v4042_v2 = vmov 0.0   ;;  %v4036_v3 = vmov 5   ;;  %v2796_v4 = vld [vmem:[%s4019_s3 + $0x18] sm:$0xff]  ;;  %v510_v17 = vlaneseq }
  0x1e   : > { %2558 = vset.pattern.permute.xlu1 %v4040_v1  ;;  %449 = vmatprep.mubr.f32.mxu0 %v4042_v2  ;;  %v2808_v5 = vld [vmem:[%s4019_s3] sm:$0xff]  ;;  %v4033_v11 = vmov 8   ;;  %vm366_vm0 = vcmask 130048   ;;  %v4035_v14 = vmov 7   ;;  %v325_v15 = vld [vmem:[%s4017_s1 + $0x8] sm:$0xff]  ;;  %v326_v18 = vld [vmem:[%s4017_s1 + $0x10] sm:$0xff] }
  0x1f   : > { %1009 = vperm.xlu1 %2558, %v2783_v0   ;;  %s4080_s28 = smov (!%p310_p0, %s2758_s28), 1  ;;  %2559 = vset.pattern.permute.xlu0 %v4036_v3  ;;  %v324_v13 = vld [vmem:[%s4017_s1] sm:$0xff]  ;;  %v2828_v16 = vld [vmem:[%s4019_s3 + $0x8] sm:$0xff]  ;;  %v511_v19 = vand.u32 127, %v510_v17  ;;  %v327_v20 = vld [vmem:[%s4017_s1 + $0x18] sm:$0xff]  ;;  %v4031_v21 = vmov 3  }
  0x20   : > { %1412 = vperm.xlu0 %2559, %v2783_v0   ;;  %s2507_s17 = sshll.u32 %s4080_s28, 5  ;;  %v4025_v23 = vmov 2   ;;  %v4027_v26 = vmov 1   ;;  %s2697_s13 = smov 113   ;;  %v332_v30 = vld [vmem:[%s4018_s2 + $0x10] sm:$0xff]  ;;  %v4038_v31 = vmov 0  }
  0x21   : > { %s314_s20 = scalar_lea.vmem %s4016_s0, %s2507_s17  ;;  %v512_v22 = vadd.s32 128, %v511_v19  ;;  %v517_v24 = vand.u32 15, %v511_v19  ;;  %v333_v32 = vld [vmem:[%s4018_s2 + $0x18] sm:$0xff]  ;;  %v330_v33 = vld [vmem:[%s4018_s2] sm:$0xff]  ;;  %v331_v34 = vld [vmem:[%s4018_s2 + $0x8] sm:$0xff]  ;;  %v4029_v37 = vmov 6   ;;  %s319_s10 = scalar_lea.vmem %s4024_s8, %s2507_s17 }
  0x22   : > { %v321_v6 = vld [vmem:[%s314_s20 + $0x8] sm:$0xff]  ;;  %v323_v7 = vld [vmem:[%s314_s20 + $0x18] sm:$0xff]  ;;  %v320_v8 = vld [vmem:[%s314_s20] sm:$0xff]  ;;  %s2700_s23 = smov 111   ;;  %s2701_s26 = smov 112   ;;  %vm717_vm5 = vcmask 916480  }
  0x23   : > { %1013 = vperm.xlu1 %2558, %v2796_v4   ;;  %v2509_v9 = vpack.c.bf16 %v323_v7, %v321_v6  ;;  %v322_v10 = vld [vmem:[%s314_s20 + $0x10] sm:$0xff]  ;;  %v524_v25 = vand.u32 15, %v512_v22  ;;  %vm543_vm1 = vcmp.le.s32.totalorder %v517_v24, 14  ;;  %vm537_vm3 = vcmp.ge.s32.totalorder %v517_v24, 1  ;;  %s2702_s29 = smov 96   ;;  %s2703_s12 = smov 127  }
  0x24   : > { %2566 = vset.pattern.permute.xlu0 %v4033_v11  ;;  %v2511_v12 = vpack.c.bf16 %v322_v10, %v320_v8  ;;  %v2498_v27 = vsel %vm543_vm1, 1.0, %v4042_v2  ;;  %v2496_v35 = vsel %vm537_vm3, 1.0, %v4042_v2  ;;  %v1825_v39 = vld [vmem:[%s4020_s4 + $0x10] sm:$0xff]  ;;  %vm880_vm6 = vcmask 785408   ;;  %s2705_s16 = smov 17   ;;  %s2501_s14 = sld [smem:[#allocation3 + $0x1]] }
  0x25   : > { %1548 = vperm.xlu0 %2566, %v2808_v5   ;;  %2510 = vmatprep.subr.bf16.mxu0 %v2509_v9  ;;  %vm544_vm2 = vcmp.le.s32.totalorder %v524_v25, 14  ;;  %vm538_vm4 = vcmp.ge.s32.totalorder %v524_v25, 1  ;;  %vm1697_vm7 = vcmask 924672   ;;  %vm935_vm8 = vcmask 908288   ;;  %s2706_s19 = smov 120   ;;  %s2101_s22 = sld [smem:[#allocation3]] }
  0x26   : > { %2512 = vmatpush1.bf16.msra.mxu0 %v2511_v12  ;;  %v2499_v28 = vsel %vm544_vm2, 1.0, %v4042_v2  ;;  %v2497_v36 = vsel %vm538_vm4, 1.0, %v4042_v2  ;;  %vm1312_vm9 = vcmask 1039360   ;;  %vm1774_vm10 = vcmask 1031168  }
  0x27   : > { %2560 = vset.pattern.permute.xlu1 %v4036_v3  ;;  %v2582_v29 = vpack.i.bf16 %v2499_v28, %v2498_v27  ;;  %v2591_v38 = vpack.i.bf16 %v2497_v36, %v2496_v35  ;;  %vm1901_vm11 = vcmask 138240   ;;  %vm2206_vm12 = vcmask 130112  }
  0x28   : > { %1416 = vperm.xlu1 %2560, %v2796_v4   ;;  %vm2104_vm13 = vcmask 64512  }
  0x29   : > { %2567 = vset.pattern.permute.xlu0 %v4035_v14  ;;  %2490 = vmatmul.mubr.msk.f32.vlgmr.msra.gmra.mrb[0].mxu0 %vm366_vm0, %v324_v13 }
  0x2a   : > { %1127 = vperm.xlu0 %2567, %v2796_v4   ;;  %455 = vmatprep.mubr.f32.mxu0 %v4042_v2 }
  0x2c   : > { %2561 = vset.pattern.permute.xlu1 %v4035_v14 }
  0x2d   : > { %1123 = vperm.xlu1 %2561, %v2783_v0   ;;  %2491 = vmatmul.mubr.msk.f32.gmra.mrb[2].mxu0 %vm366_vm0, %v325_v15 }
  0x2e   : > { %1119 = vperm.xlu0 %2567, %v2828_v16   ;;  %461 = vmatprep.mubr.f32.mxu0 %v4042_v2 }
  0x31   : > { %2562 = vset.pattern.permute.xlu1 %v4033_v11  ;;  %2492 = vmatmul.mubr.msk.f32.gmra.mrb[4].mxu0 %vm366_vm0, %v326_v18 }
  0x32   : > { %1556 = vperm.xlu1 %2562, %v2783_v0   ;;  %467 = vmatprep.mubr.f32.mxu0 %v4042_v2 }
  0x33   : > { %2572 = vset.pattern.permute.xlu0 %v4031_v21 }
  0x34   : > { %634 = vperm.xlu0 %2572, %v2796_v4  }
  0x35   : > { %2493 = vmatmul.mubr.msk.f32.gmra.mrb[6].mxu0 %vm366_vm0, %v327_v20  ;;  %v1826_v20 = vld [vmem:[%s4020_s4 + $0x18] sm:$0xff] }
  0x36   : > { %1560 = vperm.xlu1 %2562, %v2796_v4   ;;  %473 = vmatprep.mubr.f32.mxu0 %v4042_v2 }
  0x38   : > { %2576 = vset.pattern.permute.xlu0 %v4025_v23 }
  0x39   : > { %1374 = vperm.xlu0 %2576, %v2796_v4  }
  0x3a   : > { %2563 = vset.pattern.permute.xlu1 %v4040_v1 }
  0x3b   : > { %1001 = vperm.xlu1 %2563, %v2808_v5  }
  0x3d   : > { %2577 = vset.pattern.permute.xlu0 %v4027_v26 }
  0x3e   : > { %967 = vperm.xlu0 %2577, %v2783_v0  }
  0x3f   : > { %2564 = vset.pattern.permute.xlu1 %v4036_v3 }
  0x40   : > { %1404 = vperm.xlu1 %2564, %v2808_v5  }
  0x42   : > { %959 = vperm.xlu0 %2577, %v2808_v5  }
  0x44   : > { %2565 = vset.pattern.permute.xlu1 %v4035_v14 }
  0x45   : > { %1115 = vperm.xlu1 %2565, %v2808_v5  }
  0x46   : > { %2583 = vrot.lane.b32.xlu0 %v2582_v29, %s2697_s13  ;;  %s2704_s13 = smov 126  }
  0x49   : > { %2568 = vset.pattern.permute.xlu1 %v4040_v1 }
  0x4a   : > { %1005 = vperm.xlu1 %2568, %v2828_v16   ;;  %963 = vperm.xlu0 %2577, %v2828_v16  }
  0x4e   : > { %2569 = vset.pattern.permute.xlu1 %v4036_v3  ;;  %2588 = vset.pattern.permute.xlu0 %v4038_v31 }
  0x4f   : > { %1408 = vperm.xlu1 %2569, %v2828_v16   ;;  %348 = vperm.xlu0 %2588, %v332_v30  }
  0x53   : > { %2570 = vset.pattern.permute.xlu1 %v4033_v11  ;;  %353 = vperm.xlu0 %2588, %v333_v32  }
  0x54   : > { %1552 = vperm.xlu1 %2570, %v2828_v16  }
  0x57   : > { %338 = vperm.xlu0 %2588, %v330_v33  }
  0x58   : > { %2571 = vset.pattern.permute.xlu1 %v4031_v21 }
  0x59   : > { %630 = vperm.xlu1 %2571, %v2783_v0  }
  0x5b   : > { %343 = vperm.xlu0 %2588, %v331_v34  }
  0x5d   : > { %2573 = vset.pattern.permute.xlu1 %v4029_v37 }
  0x5e   : > { %793 = vperm.xlu1 %2573, %v2783_v0  }
  0x5f   : > { %585 = vperm.xlu0 %2588, %v2783_v0  }
  0x62   : > { %797 = vperm.xlu1 %2573, %v2796_v4  }
  0x63   : > { %2592 = vrot.lane.b32.xlu0 %v2591_v38, %s2700_s23 }
  0x66   : > { %2574 = vset.pattern.permute.xlu1 %v4027_v26 }
  0x67   : > { %971 = vperm.xlu1 %2574, %v2796_v4  }
  0x6b   : > { %2575 = vset.pattern.permute.xlu1 %v4025_v23 }
  0x6c   : > { %1370 = vperm.xlu1 %2575, %v2783_v0  }
  0x70   : > { %2578 = vset.pattern.permute.xlu1 %v4031_v21 }
  0x71   : > { %622 = vperm.xlu1 %2578, %v2808_v5  }
  0x75   : > { %2579 = vset.pattern.permute.xlu1 %v4029_v37 }
  0x76   : > { %785 = vperm.xlu1 %2579, %v2808_v5  }
  0x7a   : > { %2580 = vset.pattern.permute.xlu1 %v4025_v23 }
  0x7b   : > { %1362 = vperm.xlu1 %2580, %v2808_v5  }
  0x7f   : > { %2581 = vset.pattern.permute.xlu1 %v4031_v21 }
  0x80   : > { %626 = vperm.xlu1 %2581, %v2828_v16  }
  0x84   : > { %2587 = vset.pattern.permute.xlu1 %v4029_v37 }
  0x85   : > { %789 = vperm.xlu1 %2587, %v2828_v16  }
  0x89   : > { %2589 = vset.pattern.permute.xlu1 %v4025_v23 }
  0x8a   : > { %1366 = vperm.xlu1 %2589, %v2828_v16  }
  0x8e   : > { %2590 = vset.pattern.permute.xlu1 %v4038_v31 }
  0x8f   : > { %590 = vperm.xlu1 %2590, %v2796_v4  }
  0x93   : > { %575 = vperm.xlu1 %2590, %v2808_v5  }
  0x97   : > { %1841 = vperm.xlu1 %2590, %v1825_v39  }
  0x9e   : > { %v2913_v40 = vpop.permute.xlu1 %1009 }
  0x9f   : > { %v2915_v41 = vpop.permute.xlu0 %1412 }
  0xa0   : > { %v1435_v42 = vmul.f32 0.0, %v2915_v41 }
  0xa2   : > { %1479 = vrot.lane.b32.xlu1 %v1435_v42, %s2701_s26  ;;  %v2919_v43 = vpop.permute.xlu1 %1013 }
  0xa4   : > { %v2921_v44 = vpop.permute.xlu0 %1548 }
  0xa5   : > { %v1573_v58 = vmul.f32 0.0, %v2921_v44 }
  0xa7   : > { %v2923_v45 = vpop.permute.xlu1 %1416 }
  0xa8   : > { %v1438_v46 = vmul.f32 0.0, %v2923_v45 }
  0xa9   : > { %v2926_v47 = vpop.permute.xlu0 %1127 }
  0xaa   : > { %1485 = vrot.lane.b32.xlu0 %v1438_v46, %s2701_s26  ;;  %v1149_v48 = vmul.f32 0.0, %v2926_v47 }
  0xac   : > { %v2930_v49 = vpop.permute.xlu1 %1123 }
  0xad   : > { %v1146_v50 = vmul.f32 0.0, %v2930_v49  ;;  %v2948_v59 = vpop.permute.xlu0 %1119 }
  0xae   : > { %1196 = vrot.lane.b32.xlu0 %v1149_v48, %s2702_s29  ;;  %v1143_v62 = vmul.f32 0.0, %v2948_v59 }
  0xaf   : > { %1190 = vrot.lane.b32.xlu1 %v1146_v50, %s2702_s29 }
  0xb1   : > { %v2935_v51 = vpop.permute.xlu1 %1556 }
  0xb2   : > { %v1579_v52 = vmul.f32 0.0, %v2935_v51 }
  0xb3   : > { %v2956_v63 = vpop.permute.xlu0 %634 }
  0xb4   : > { %1623 = vrot.lane.b32.xlu1 %v1579_v52, %s2702_s29  ;;  %v654_v4 = vmul.f32 0.0, %v2956_v63 }
  0xb5   : > { %v2939_v53 = vpop.permute.xlu1 %1560 }
  0xb6   : > { %v1582_v54 = vmul.f32 0.0, %v2939_v53 }
  0xb8   : > { %1629 = vrot.lane.b32.xlu0 %v1582_v54, %s2702_s29  ;;  %v2967_v7 = vpop.permute.xlu0 %1374 }
  0xba   : > { %v1002_v55 = vpop.permute.xlu1 %1001 }
  0xbd   : > { %v2975_v12 = vpop.permute.xlu0 %967 }
  0xbf   : > { %v2943_v56 = vpop.permute.xlu1 %1404 }
  0xc0   : > { %v1429_v57 = vmul.f32 0.0, %v2943_v56 }
  0xc1   : > { %v2982_v18 = vpop.permute.xlu0 %959 }
  0xc2   : > { %1467 = vrot.lane.b32.xlu0 %v1429_v57, %s2701_s26 }
  0xc4   : > { %v2950_v60 = vpop.permute.xlu1 %1115 }
  0xc5   : > { %v1140_v61 = vmul.f32 0.0, %v2950_v60  ;;  %v2992_v24 = vpop.permute.xlu0 %2583 }
  0xc6   : > { %1611 = vrot.lane.b32.xlu0 %v1573_v58, %s2702_s29 }
  0xc7   : > { %1178 = vrot.lane.b32.xlu1 %v1140_v61, %s2702_s29 }
  0xc9   : > { %v2958_v0 = vpop.permute.xlu1 %1005  ;;  %v2998_v27 = vpop.permute.xlu0 %963 }
  0xca   : > { %1184 = vrot.lane.b32.xlu0 %v1143_v62, %s2702_s29 }
  0xce   : > { %v2962_v5 = vpop.permute.xlu1 %1408  ;;  %699 = vrot.lane.b32.xlu0 %v654_v4, %s2701_s26  ;;  %v349_v30 = vpop.permute.xlu0 %348 }
  0xcf   : > { %v1432_v6 = vmul.f32 0.0, %v2962_v5 }
  0xd1   : > { %1473 = vrot.lane.b32.xlu1 %v1432_v6, %s2701_s26 }
  0xd2   : > { %v3006_v33 = vpop.permute.xlu0 %353 }
  0xd3   : > { %v2969_v8 = vpop.permute.xlu1 %1552 }
  0xd4   : > { %v1576_v9 = vmul.f32 0.0, %v2969_v8 }
  0xd6   : > { %1617 = vrot.lane.b32.xlu1 %v1576_v9, %s2702_s29  ;;  %v339_v34 = vpop.permute.xlu0 %338 }
  0xd8   : > { %v2973_v10 = vpop.permute.xlu1 %630 }
  0xd9   : > { %v651_v13 = vmul.f32 0.0, %v2973_v10 }
  0xdb   : > { %693 = vrot.lane.b32.xlu1 %v651_v13, %s2701_s26 }
  0xdd   : > { %v2979_v15 = vpop.permute.xlu1 %793 }
  0xde   : > { %v816_v17 = vmul.f32 0.0, %v2979_v15 }
  0xe0   : > { %860 = vrot.lane.b32.xlu0 %v816_v17, %s2702_s29 }
  0xe1   : > { %v2985_v19 = vpop.permute.xlu1 %797 }
  0xe2   : > { %v819_v22 = vmul.f32 0.0, %v2985_v19 }
  0xe4   : > { %866 = vrot.lane.b32.xlu1 %v819_v22, %s2702_s29  ;;  %1846 = vperm.xlu0 %2588, %v1826_v20  }
  0xe6   : > { %v2994_v25 = vpop.permute.xlu1 %971 }
  0xe8   : > { %580 = vperm.xlu1 %2590, %v2828_v16   ;;  %2633 = vset.pattern.permute.xlu0 %v4035_v14  ;;  %v3256_v14 = vunpack.i.l.bf16 %v2992_v24 }
  0xeb   : > { %v3000_v28 = vpop.permute.xlu1 %1370 }
  0xf0   : > { %v3002_v29 = vpop.permute.xlu1 %622 }
  0xf1   : > { %v645_v32 = vmul.f32 0.0, %v3002_v29 }
  0xf3   : > { %681 = vrot.lane.b32.xlu0 %v645_v32, %s2701_s26 }
  0xf5   : > { %v3052_v22 = vpop.permute.xlu1 %785 }
  0xfc   : > { %v451_v35 = vpop.f32.mrb[0].mxu0 }
  0xfd   : > { %v3008_v36 = vadd.f32 %v451_v35, %v339_v34  ;;  %v453_v16 = vpop.f32.mrb[1].mxu0 }
  0xfe   : > { %v3010_v38 = vadd.f32 %v453_v16, %v339_v34 }
  0xff   : > { %4051 = vst [vmem:[#allocation6_spill] sm:$0xff] %v3008_v36  ;;  %v1138_v39 = vmul.f32 %v2950_v60, %v3008_v36  ;;  %v1024_v42 = vmul.f32 %v1002_v55, %v3008_v36  ;;  %v1427_v52 = vmul.f32 %v2943_v56, %v3008_v36  ;;  %v1571_v61 = vmul.f32 %v2921_v44, %v3008_v36 }
 0x100   : > { %v457_v46 = vpop.f32.mrb[2].mxu0  ;;  %v1025_v50 = vmul.f32 %v1002_v55, %v3010_v38  ;;  %v1428_v58 = vmul.f32 %v2943_v56, %v3010_v38  ;;  %v344_v55 = vpop.permute.xlu0 %343  ;;  %v1572_v9 = vmul.f32 %v2921_v44, %v3010_v38  ;;  %v1139_v13 = vmul.f32 %v2950_v60, %v3010_v38 }
 0x101   : > { %v459_v48 = vpop.f32.mrb[3].mxu0  ;;  %1174 = vrot.lane.b32.xlu1 %v1138_v39, %s2702_s29  ;;  %1048 = vrot.lane.b32.xlu0 %v1024_v42, %s2701_s26  ;;  %v3030_v6 = vadd.f32 %v457_v46, %v344_v55  ;;  %v3066_v39 = vpop.permute.xlu1 %1362 }
 0x102   : > { %v3038_v56 = vadd.f32 %v459_v48, %v344_v55 }
 0x103   : > { %v1026_v17 = vmul.f32 %v2958_v0, %v3030_v6  ;;  %v1141_v20 = vmul.f32 %v2948_v59, %v3030_v6  ;;  %v1430_v44 = vmul.f32 %v2962_v5, %v3030_v6  ;;  %v1574_v32 = vmul.f32 %v2969_v8, %v3030_v6 }
 0x104   : > { %v463_v54 = vpop.f32.mrb[4].mxu0  ;;  %v1027_v60 = vmul.f32 %v2958_v0, %v3038_v56  ;;  %v1431_v34 = vmul.f32 %v2962_v5, %v3038_v56  ;;  %v1142_v0 = vmul.f32 %v2948_v59, %v3038_v56  ;;  %v1575_v16 = vmul.f32 %v2969_v8, %v3038_v56 }
 0x105   : > { %v465_v57 = vpop.f32.mrb[5].mxu0  ;;  %1050 = vrot.lane.b32.xlu1 %v1025_v50, %s2701_s26  ;;  %1463 = vrot.lane.b32.xlu0 %v1427_v52, %s2701_s26  ;;  %v3060_v35 = vadd.f32 %v463_v54, %v349_v30  ;;  %v3076_v59 = vpop.permute.xlu1 %626 }
 0x106   : > { %v3078_v46 = vadd.f32 %v465_v57, %v349_v30 }
 0x107   : > { %v1028_v5 = vmul.f32 %v2913_v40, %v3060_v35  ;;  %v652_v42 = vmul.f32 %v2973_v10, %v3060_v35  ;;  %v1433_v8 = vmul.f32 %v2915_v41, %v3060_v35  ;;  %v814_v48 = vmul.f32 %v2979_v15, %v3060_v35 }
 0x108   : > { %v469_v62 = vpop.f32.mrb[6].mxu0  ;;  %v1144_v50 = vmul.f32 %v2930_v49, %v3060_v35  ;;  %v1029_v52 = vmul.f32 %v2913_v40, %v3078_v46  ;;  %v1577_v30 = vmul.f32 %v2935_v51, %v3060_v35  ;;  %v1434_v57 = vmul.f32 %v2915_v41, %v3078_v46 }
 0x109   : > { %v3026_v4 = vpop.f32.mrb[7].mxu0  ;;  %1465 = vrot.lane.b32.xlu1 %v1428_v58, %s2701_s26  ;;  %1607 = vrot.lane.b32.xlu0 %v1571_v61, %s2702_s29  ;;  %v3090_v54 = vpop.permute.xlu1 %789  ;;  %v653_v40 = vmul.f32 %v2973_v10, %v3078_v46  ;;  %v1145_v61 = vmul.f32 %v2930_v49, %v3078_v46  ;;  %v3109_v55 = vadd.f32 %v469_v62, %v3006_v33 }
 0x10a   : > { %v815_v41 = vmul.f32 %v2979_v15, %v3078_v46  ;;  %v3123_v62 = vpop.permute.xlu0 %585 }
 0x10b   : > { %v1030_v49 = vmul.f32 %v2919_v43, %v3109_v55  ;;  %v1436_v10 = vmul.f32 %v2923_v45, %v3109_v55 }
 0x10d   : > { %1609 = vrot.lane.b32.xlu1 %v1572_v9, %s2702_s29  ;;  %1176 = vrot.lane.b32.xlu0 %v1139_v13, %s2702_s29  ;;  %v3100_v58 = vpop.permute.xlu1 %1366  ;;  %v1578_v9 = vmul.f32 %v2935_v51, %v3078_v46  ;;  %v655_v51 = vmul.f32 %v2956_v63, %v3109_v55 }
 0x111   : > { %1052 = vrot.lane.b32.xlu1 %v1026_v17, %s2701_s26  ;;  %1180 = vrot.lane.b32.xlu0 %v1141_v20, %s2702_s29  ;;  %v3115_v13 = vpop.permute.xlu1 %590  ;;  %v1147_v17 = vmul.f32 %v2926_v47, %v3109_v55  ;;  %v3133_v20 = vpop.permute.xlu0 %2592 }
 0x112   : > { %4052 = vst [vmem:[#allocation7_spill] sm:$0xff] %v3115_v13 }
 0x115   : > { %1469 = vrot.lane.b32.xlu1 %v1430_v44, %s2701_s26  ;;  %1054 = vrot.lane.b32.xlu0 %v1027_v60, %s2701_s26  ;;  %v3127_v15 = vpop.permute.xlu1 %575  ;;  %v3139_v44 = vadd.f32 %v3026_v4, %v3006_v33 }
 0x116   : > { %4053 = vst [vmem:[#allocation8_spill] sm:$0xff] %v3127_v15 }
 0x117   : > { %v1031_v33 = vmul.f32 %v2919_v43, %v3139_v44  ;;  %v1581_v43 = vmul.f32 %v2939_v53, %v3139_v44 }
 0x119   : > { %1613 = vrot.lane.b32.xlu1 %v1574_v32, %s2702_s29  ;;  %1471 = vrot.lane.b32.xlu0 %v1431_v34, %s2701_s26  ;;  %v3141_v60 = vpop.permute.xlu1 %1841  ;;  %v817_v32 = vmul.f32 %v2985_v19, %v3109_v55  ;;  %v1580_v34 = vmul.f32 %v2939_v53, %v3109_v55  ;;  %v650_v53 = vmul.f32 %v3076_v59, %v3038_v56 }
 0x11a   : > { %4054 = vst [vmem:[#allocation9_spill] sm:$0xff] %v3141_v60 }
 0x11d   : > { %1182 = vrot.lane.b32.xlu1 %v1142_v0, %s2702_s29  ;;  %1615 = vrot.lane.b32.xlu0 %v1575_v16, %s2702_s29  ;;  %v3149_v0 = vpop.permute.xlu0 %1485  ;;  %v1437_v16 = vmul.f32 %v2923_v45, %v3139_v44  ;;  %v3155_v4 = vpop.permute.xlu1 %1479 }
 0x121   : > { %1056 = vrot.lane.b32.xlu1 %v1028_v5, %s2701_s26  ;;  %695 = vrot.lane.b32.xlu0 %v652_v42, %s2701_s26  ;;  %v3159_v5 = vpop.permute.xlu0 %1196  ;;  %v1148_v42 = vmul.f32 %v2926_v47, %v3139_v44  ;;  %v3167_v45 = vpop.permute.xlu1 %1190  ;;  %v648_v47 = vmul.f32 0.0, %v3076_v59 }
 0x125   : > { %1475 = vrot.lane.b32.xlu1 %v1433_v8, %s2701_s26  ;;  %856 = vrot.lane.b32.xlu0 %v814_v48, %s2702_s29  ;;  %v647_v8 = vmul.f32 %v3002_v29, %v3010_v38  ;;  %v809_v48 = vmul.f32 %v3052_v22, %v3010_v38 }
 0x129   : > { %1186 = vrot.lane.b32.xlu1 %v1144_v50, %s2702_s29  ;;  %1058 = vrot.lane.b32.xlu0 %v1029_v52, %s2701_s26  ;;  %v646_v52 = vmul.f32 %v3002_v29, %v3008_v36  ;;  %v810_v29 = vmul.f32 0.0, %v3052_v22 }
 0x12a   : > { %v3173_v50 = vpop.permute.xlu0 %1629 }
 0x12d   : > { %1619 = vrot.lane.b32.xlu1 %v1577_v30, %s2702_s29  ;;  %1477 = vrot.lane.b32.xlu0 %v1434_v57, %s2701_s26  ;;  %v3180_v30 = vpop.permute.xlu1 %1623 }
 0x131   : > { %697 = vrot.lane.b32.xlu1 %v653_v40, %s2701_s26  ;;  %1188 = vrot.lane.b32.xlu0 %v1145_v61, %s2702_s29  ;;  %v808_v40 = vmul.f32 %v3052_v22, %v3008_v36  ;;  %v1823_v22 = vld [vmem:[%s4020_s4] sm:$0xff] }
 0x134   : > { %v3182_v57 = vpop.permute.xlu0 %1467 }
 0x135   : > { %858 = vrot.lane.b32.xlu1 %v815_v41, %s2702_s29  ;;  %1621 = vrot.lane.b32.xlu0 %v1578_v9, %s2702_s29  ;;  %v811_v9 = vmul.f32 %v3090_v54, %v3030_v6 }
 0x138   : > { %v3193_v41 = vpop.permute.xlu0 %1611 }
 0x139   : > { %1060 = vrot.lane.b32.xlu1 %v1030_v49, %s2701_s26  ;;  %1481 = vrot.lane.b32.xlu0 %v1436_v10, %s2701_s26  ;;  %v1179_v61 = vpop.permute.xlu1 %1178  ;;  %v656_v10 = vmul.f32 %v2956_v63, %v3139_v44  ;;  %v812_v63 = vmul.f32 %v3090_v54, %v3038_v56 }
 0x13d   : > { %701 = vrot.lane.b32.xlu1 %v655_v51, %s2701_s26  ;;  %1192 = vrot.lane.b32.xlu0 %v1147_v17, %s2702_s29  ;;  %v649_v51 = vmul.f32 %v3076_v59, %v3030_v6  ;;  %v3205_v17 = vpop.permute.xlu0 %1184  ;;  %v813_v59 = vmul.f32 0.0, %v3090_v54 }
 0x141   : > { %862 = vrot.lane.b32.xlu1 %v817_v32, %s2702_s29  ;;  %1625 = vrot.lane.b32.xlu0 %v1580_v34, %s2702_s29  ;;  %v818_v34 = vmul.f32 %v2985_v19, %v3139_v44 }
 0x143   : > { %v3197_v49 = vpop.permute.xlu1 %1473 }
 0x145   : > { %1483 = vrot.lane.b32.xlu1 %v1437_v16, %s2701_s26  ;;  %1062 = vrot.lane.b32.xlu0 %v1031_v33, %s2701_s26  ;;  %v3216_v16 = vpop.permute.xlu0 %699 }
 0x146   : > { %4055 = vst [vmem:[#allocation10_spill] sm:$0xff] %v3216_v16  ;;  %v1393_v16 = vmul.f32 %v3000_v28, %v3078_v46 }
 0x148   : > { %v3212_v32 = vpop.permute.xlu1 %1617 }
 0x149   : > { %1194 = vrot.lane.b32.xlu1 %v1148_v42, %s2702_s29  ;;  %685 = vrot.lane.b32.xlu0 %v647_v8, %s2701_s26 }
 0x14d   : > { %1627 = vrot.lane.b32.xlu1 %v1581_v43, %s2702_s29  ;;  %846 = vrot.lane.b32.xlu0 %v809_v48, %s2702_s29  ;;  %v3222_v33 = vpop.permute.xlu1 %693 }
 0x151   : > { %687 = vrot.lane.b32.xlu0 %v648_v47, %s2701_s26  ;;  %683 = vrot.lane.b32.xlu1 %v646_v52, %s2701_s26  ;;  %v982_v47 = vmul.f32 0.0, %v2982_v18 }
 0x152   : > { %v3224_v42 = vpop.permute.xlu0 %860 }
 0x155   : > { %691 = vrot.lane.b32.xlu0 %v650_v53, %s2701_s26  ;;  %844 = vrot.lane.b32.xlu1 %v808_v40, %s2702_s29 }
 0x156   : > { %v3230_v19 = vpop.permute.xlu1 %866 }
 0x157   : > { %4057 = vst [vmem:[#allocation12_spill] sm:$0xff] %v3230_v19 }
 0x159   : > { %850 = vrot.lane.b32.xlu0 %v811_v9, %s2702_s29  ;;  %848 = vrot.lane.b32.xlu1 %v810_v29, %s2702_s29 }
 0x15d   : > { %703 = vrot.lane.b32.xlu0 %v656_v10, %s2701_s26  ;;  %689 = vrot.lane.b32.xlu1 %v649_v51, %s2701_s26 }
 0x161   : > { %864 = vrot.lane.b32.xlu0 %v818_v34, %s2702_s29  ;;  %1831 = vperm.xlu1 %2590, %v1823_v22   ;;  %v1385_v34 = vmul.f32 0.0, %v3066_v39 }
 0x163   : > { %v3228_v8 = vpop.permute.xlu0 %1846 }
 0x164   : > { %4056 = vst [vmem:[#allocation11_spill] sm:$0xff] %v3228_v8  ;;  %v990_v8 = vmul.f32 %v2975_v12, %v3078_v46 }
 0x165   : > { %854 = vrot.lane.b32.xlu0 %v813_v59, %s2702_s29  ;;  %852 = vrot.lane.b32.xlu1 %v812_v63, %s2702_s29  ;;  %v984_v59 = vmul.f32 %v2982_v18, %v3010_v38 }
 0x167   : > { %v3232_v43 = vpop.permute.xlu0 %681  ;;  %v3234_v48 = vpop.permute.xlu1 %580 }
 0x168   : > { %4058 = vst [vmem:[#allocation13_spill] sm:$0xff] %v3232_v43  ;;  %4059 = vst [vmem:[#allocation14_spill] sm:$0xff] %v3234_v48 }
 0x173   : > { %v1175_v52 = vpop.permute.xlu1 %1174  ;;  %v1049_v54 = vpop.permute.xlu0 %1048 }
 0x174   : > { %v1096_v53 = vadd.f32 %v1049_v54, %v982_v47  ;;  %v983_v47 = vmul.f32 %v2982_v18, %v3008_v36 }
 0x176   : > { %v1240_v40 = vadd.f32 %v1175_v52, %v1096_v53  ;;  %v1386_v53 = vmul.f32 %v3066_v39, %v3008_v36 }
 0x177   : > { %v1051_v29 = vpop.permute.xlu1 %1050  ;;  %v1464_v9 = vpop.permute.xlu0 %1463 }
 0x178   : > { %1276 = vrot.lane.b32.xlu1 %v1240_v40, %s2703_s12  ;;  %v1072_v22 = vsel %vm717_vm5, %v1049_v54, %v1051_v29  ;;  %v3251_v40 = vunpack.i.h.bf16 %v2992_v24  ;;  %v1098_v23 = vadd.f32 %v1051_v29, %v984_v59  ;;  %v1529_v26 = vadd.f32 %v1464_v9, %v1385_v34 }
 0x179   : > { %v1097_v54 = vadd.f32 %v1072_v22, %v983_v47  ;;  %v988_v34 = vmul.f32 0.0, %v2975_v12 }
 0x17a   : > { %v3271_v24 = vsel %vm1697_vm7, %v3256_v14, %v3251_v40 }
 0x17b   : > { %v3238_v10 = vpop.permute.xlu1 %1465  ;;  %v1608_v51 = vpop.permute.xlu0 %1607 }
 0x17c   : > { %v1499_v63 = vsel %vm717_vm5, %v1464_v9, %v3238_v10  ;;  %v1673_v1 = vadd.f32 %v1608_v51, %v1529_v26 }
 0x17d   : > { %v1530_v37 = vadd.f32 %v1499_v63, %v1386_v53 }
 0x17f   : > { %v3253_v21 = vpop.permute.xlu1 %1609  ;;  %v1177_v11 = vpop.permute.xlu0 %1176 }
 0x180   : > { %v1643_v18 = vsel %vm880_vm6, %v1608_v51, %v3253_v21  ;;  %v1210_v3 = vsel %vm880_vm6, %v1175_v52, %v1177_v11  ;;  %v1211_v31 = vsel %vm880_vm6, %v1177_v11, %v1179_v61  ;;  %v1702_v52 = vmul.f32 %v3256_v14, %v1673_v1 }
 0x181   : > { %v1674_v2 = vadd.f32 %v1643_v18, %v1530_v37  ;;  %v1241_v48 = vadd.f32 %v1210_v3, %v1097_v54  ;;  %v1242_v22 = vadd.f32 %v1211_v31, %v1098_v23 }
 0x183   : > { %v3262_v29 = vpop.permute.xlu1 %1052  ;;  %v3264_v9 = vpop.permute.xlu0 %1180  ;;  %1278 = vrot.lane.b32.xlu0 %v1241_v48, %s2703_s12  ;;  %1280 = vrot.lane.b32.xlu1 %v1242_v22, %s2703_s12  ;;  %v1703_v11 = vmul.f32 %v3271_v24, %v1674_v2 }
 0x187   : > { %v3275_v26 = vpop.permute.xlu1 %1469  ;;  %v3277_v3 = vpop.permute.xlu0 %1054  ;;  %1738 = vrot.lane.b32.xlu0 %v1702_v52, %s2704_s13  ;;  %1740 = vrot.lane.b32.xlu1 %v1703_v11, %s2704_s13  ;;  %v1391_v52 = vmul.f32 0.0, %v3000_v28  ;;  %v989_v11 = vmul.f32 %v2975_v12, %v3060_v35 }
 0x18b   : > { %v3281_v23 = vpop.permute.xlu1 %1613  ;;  %v3283_v31 = vpop.permute.xlu0 %1471 }
 0x18f   : > { %v3285_v37 = vpop.permute.xlu1 %1182  ;;  %v3287_v61 = vpop.permute.xlu0 %1615 }
 0x193   : > { %v1057_v1 = vpop.permute.xlu1 %1056  ;;  %v3289_v48 = vpop.permute.xlu0 %695 }
 0x194   : > { %v1102_v63 = vadd.f32 %v1057_v1, %v988_v34 }
 0x197   : > { %v1476_v2 = vpop.permute.xlu1 %1475  ;;  %v3291_v51 = vpop.permute.xlu0 %856 }
 0x198   : > { %v1535_v36 = vadd.f32 %v1476_v2, %v1391_v52 }
 0x19b   : > { %v1187_v59 = vpop.permute.xlu1 %1186  ;;  %v1059_v47 = vpop.permute.xlu0 %1058 }
 0x19c   : > { %v1246_v53 = vadd.f32 %v1187_v59, %v1102_v63  ;;  %v1074_v22 = vsel %vm717_vm5, %v1057_v1, %v1059_v47  ;;  %v1104_v34 = vadd.f32 %v1059_v47, %v990_v8 }
 0x19d   : > { %v1103_v19 = vadd.f32 %v1074_v22, %v989_v11 }
 0x19e   : > { %1288 = vrot.lane.b32.xlu0 %v1246_v53, %s2703_s12 }
 0x19f   : > { %v1620_v54 = vpop.permute.xlu1 %1619  ;;  %v1478_v18 = vpop.permute.xlu0 %1477 }
 0x1a0   : > { %v1504_v53 = vsel %vm717_vm5, %v1478_v18, %v3155_v4  ;;  %v1679_v13 = vadd.f32 %v1620_v54, %v1535_v36  ;;  %v1503_v36 = vsel %vm717_vm5, %v1476_v2, %v1478_v18 }
 0x1a1   : > { %v1537_v52 = vadd.f32 %v1504_v53, %v1393_v16  ;;  %v1392_v16 = vmul.f32 %v3000_v28, %v3060_v35 }
 0x1a3   : > { %v3301_v15 = vpop.permute.xlu1 %697  ;;  %v1189_v63 = vpop.permute.xlu0 %1188 }
 0x1a4   : > { %v1214_v43 = vsel %vm880_vm6, %v1187_v59, %v1189_v63  ;;  %v1215_v1 = vsel %vm880_vm6, %v1189_v63, %v3167_v45  ;;  %v1708_v59 = vmul.f32 %v3256_v14, %v1679_v13 }
 0x1a5   : > { %v1247_v60 = vadd.f32 %v1214_v43, %v1103_v19  ;;  %v1248_v12 = vadd.f32 %v1215_v1, %v1104_v34  ;;  %v991_v19 = vmul.f32 0.0, %v2994_v25  ;;  %v1536_v34 = vadd.f32 %v1503_v36, %v1392_v16 }
 0x1a6   : > { %v1395_v36 = vmul.f32 %v2967_v7, %v3109_v55 }
 0x1a7   : > { %v3310_v22 = vpop.permute.xlu1 %858  ;;  %v1622_v8 = vpop.permute.xlu0 %1621  ;;  %1292 = vrot.lane.b32.xlu0 %v1248_v12, %s2703_s12  ;;  %1290 = vrot.lane.b32.xlu1 %v1247_v60, %s2703_s12 }
 0x1a8   : > { %v1648_v4 = vsel %vm880_vm6, %v1622_v8, %v3180_v30  ;;  %v1647_v43 = vsel %vm880_vm6, %v1620_v54, %v1622_v8  ;;  %v1394_v8 = vmul.f32 0.0, %v2967_v7 }
 0x1a9   : > { %v1681_v45 = vadd.f32 %v1648_v4, %v1537_v52  ;;  %v1680_v2 = vadd.f32 %v1647_v43, %v1536_v34  ;;  %v992_v4 = vmul.f32 %v2994_v25, %v3109_v55 }
 0x1ab   : > { %v1061_v47 = vpop.permute.xlu1 %1060  ;;  %v1482_v11 = vpop.permute.xlu0 %1481  ;;  %1750 = vrot.lane.b32.xlu0 %v1708_v59, %s2704_s13  ;;  %v1710_v60 = vmul.f32 %v3251_v40, %v1681_v45  ;;  %v1709_v1 = vmul.f32 %v3271_v24, %v1680_v2  ;;  %v993_v59 = vmul.f32 %v2994_v25, %v3139_v44  ;;  %v1396_v25 = vmul.f32 %v2967_v7, %v3139_v44 }
 0x1ac   : > { %v1105_v30 = vadd.f32 %v1061_v47, %v991_v19  ;;  %v1538_v45 = vadd.f32 %v1482_v11, %v1394_v8  ;;  %v1644_v7 = vsel %vm880_vm6, %v3253_v21, %v3193_v41  ;;  %v1073_v41 = vsel %vm717_vm5, %v3262_v29, %v3277_v3 }
 0x1af   : > { %v3324_v63 = vpop.permute.xlu1 %701  ;;  %v1193_v13 = vpop.permute.xlu0 %1192  ;;  %1754 = vrot.lane.b32.xlu0 %v1710_v60, %s2704_s13 }
 0x1b0   : > { %v1249_v18 = vadd.f32 %v1193_v13, %v1105_v30 }
 0x1b2   : > { %1294 = vrot.lane.b32.xlu1 %v1249_v18, %s2703_s12 }
 0x1b3   : > { %v3328_v53 = vpop.permute.xlu1 %862  ;;  %v1626_v28 = vpop.permute.xlu0 %1625 }
 0x1b4   : > { %v1682_v2 = vadd.f32 %v1626_v28, %v1538_v45  ;;  %v985_v45 = vmul.f32 0.0, %v2998_v27 }
 0x1b6   : > { %1752 = vrot.lane.b32.xlu1 %v1709_v1, %s2704_s13 }
 0x1b7   : > { %v1484_v54 = vpop.permute.xlu1 %1483  ;;  %v1063_v12 = vpop.permute.xlu0 %1062 }
 0x1b8   : > { %v1075_v52 = vsel %vm717_vm5, %v1061_v47, %v1063_v12  ;;  %v1107_v19 = vadd.f32 %v1063_v12, %v993_v59  ;;  %v1505_v60 = vsel %vm717_vm5, %v1482_v11, %v1484_v54  ;;  %v1506_v47 = vsel %vm717_vm5, %v1484_v54, %v3149_v0 }
 0x1b9   : > { %v1106_v16 = vadd.f32 %v1075_v52, %v992_v4  ;;  %v1500_v12 = vsel %vm717_vm5, %v3238_v10, %v3182_v57  ;;  %v1387_v11 = vmul.f32 %v3066_v39, %v3010_v38  ;;  %v1539_v52 = vadd.f32 %v1505_v60, %v1395_v36 }
 0x1ba   : > { %v1540_v0 = vadd.f32 %v1506_v47, %v1396_v25  ;;  %v1711_v10 = vmul.f32 %v3256_v14, %v1682_v2  ;;  %v1501_v60 = vsel %vm717_vm5, %v3275_v26, %v3283_v31  ;;  %v1390_v25 = vmul.f32 %v3100_v58, %v3038_v56 }
 0x1bb   : > { %v1195_v43 = vpop.permute.xlu1 %1194  ;;  %v1531_v57 = vadd.f32 %v1500_v12, %v1387_v11 }
 0x1bc   : > { %v1216_v34 = vsel %vm880_vm6, %v1193_v13, %v1195_v43  ;;  %v1217_v30 = vsel %vm880_vm6, %v1195_v43, %v3159_v5  ;;  %v1389_v43 = vmul.f32 %v3100_v58, %v3030_v6 }
 0x1bd   : > { %v1250_v18 = vadd.f32 %v1216_v34, %v1106_v16  ;;  %v1251_v1 = vadd.f32 %v1217_v30, %v1107_v19  ;;  %v1675_v4 = vadd.f32 %v1644_v7, %v1531_v57  ;;  %v1388_v16 = vmul.f32 0.0, %v3100_v58 }
 0x1be   : > { %v986_v19 = vmul.f32 %v2998_v27, %v3030_v6  ;;  %v987_v30 = vmul.f32 %v2998_v27, %v3038_v56  ;;  %v1533_v12 = vadd.f32 %v1501_v60, %v1389_v43  ;;  %v1646_v58 = vsel %vm880_vm6, %v3287_v61, %v3212_v32  ;;  %v3417_v32 = vpop.permute.xlu0 %685 }
 0x1bf   : > { %v1628_v54 = vpop.permute.xlu1 %1627  ;;  %1296 = vrot.lane.b32.xlu0 %v1250_v18, %s2703_s12  ;;  %1298 = vrot.lane.b32.xlu1 %v1251_v1, %s2703_s12  ;;  %v1704_v21 = vmul.f32 %v3251_v40, %v1675_v4  ;;  %v1532_v34 = vadd.f32 %v3275_v26, %v1388_v16  ;;  %v1502_v18 = vsel %vm717_vm5, %v3283_v31, %v3197_v49 }
 0x1c0   : > { %v1649_v5 = vsel %vm880_vm6, %v1626_v28, %v1628_v54  ;;  %v1650_v13 = vsel %vm880_vm6, %v1628_v54, %v3173_v50  ;;  %v1099_v50 = vadd.f32 %v3262_v29, %v985_v45  ;;  %v1824_v28 = vld [vmem:[%s4020_s4 + $0x8] sm:$0xff]  ;;  %v1212_v29 = vsel %vm880_vm6, %v3264_v9, %v3285_v37 }
 0x1c1   : > { %v1683_v39 = vadd.f32 %v1649_v5, %v1539_v52  ;;  %v1684_v8 = vadd.f32 %v1650_v13, %v1540_v0  ;;  %v1100_v2 = vadd.f32 %v1073_v41, %v986_v19  ;;  %v1213_v1 = vsel %vm880_vm6, %v3285_v37, %v3205_v17 }
 0x1c2   : > { %v1243_v47 = vadd.f32 %v3264_v9, %v1099_v50  ;;  %v1645_v9 = vsel %vm880_vm6, %v3281_v23, %v3287_v61  ;;  %v1101_v26 = vadd.f32 %v3277_v3, %v987_v30  ;;  %v1676_v27 = vadd.f32 %v3281_v23, %v1532_v34  ;;  %v3419_v61 = vpop.permute.xlu0 %846 }
 0x1c3   : > { %v1712_v59 = vmul.f32 %v3271_v24, %v1683_v39  ;;  %1756 = vrot.lane.b32.xlu1 %v1711_v10, %s2704_s13  ;;  %v1713_v36 = vmul.f32 %v3251_v40, %v1684_v8  ;;  %v1244_v11 = vadd.f32 %v1212_v29, %v1100_v2  ;;  %v1534_v49 = vadd.f32 %v1502_v18, %v1390_v25  ;;  %v3425_v7 = vpop.permute.xlu1 %683 }
 0x1c4   : > { %v1245_v31 = vadd.f32 %v1213_v1, %v1101_v26  ;;  %v1677_v52 = vadd.f32 %v1645_v9, %v1533_v12  ;;  %v1705_v17 = vmul.f32 %v3256_v14, %v1676_v27  ;;  %v886_v19 = vsel %vm880_vm6, %v3310_v22, %v3224_v42 }
 0x1c5   : > { %1758 = vrot.lane.b32.xlu0 %v1712_v59, %s2704_s13  ;;  %v1678_v37 = vadd.f32 %v1646_v58, %v1534_v49  ;;  %v609_v34 = vmul.f32 0.0, %v3123_v62  ;;  %v3464_v30 = vunpack.i.h.bf16 %v3133_v20  ;;  %v723_v2 = vsel %vm717_vm5, %v3289_v48, %v3301_v15 }
 0x1c6   : > { %v1706_v3 = vmul.f32 %v3271_v24, %v1677_v52  ;;  %v3421_v0 = vpop.permute.xlu0 %687  ;;  %v610_v18 = vmul.f32 %v3123_v62, %v3060_v35  ;;  %v3478_v12 = vunpack.i.l.bf16 %v3133_v20  ;;  %v4060_v35 = vld [vmem:[#allocation9_spill] sm:$0xff] }
 0x1c7   : > { %1760 = vrot.lane.b32.xlu1 %v1713_v36, %s2704_s13  ;;  %v1707_v23 = vmul.f32 %v3251_v40, %v1678_v37  ;;  %v3429_v13 = vpop.permute.xlu1 %844 }
 0x1c8   : > { %v755_v9 = vadd.f32 %v723_v2, %v610_v18  ;;  %v4063_v2 = vld [vmem:[#allocation13_spill] sm:$0xff] }
 0x1c9   : > { %1742 = vrot.lane.b32.xlu0 %v1704_v21, %s2704_s13 }
 0x1ca   : > { %v3423_v54 = vpop.permute.xlu0 %691 }
 0x1cb   : > { %1836 = vperm.xlu1 %2590, %v1824_v28   ;;  %v3433_v10 = vpop.permute.xlu1 %848  ;;  %v611_v28 = vmul.f32 %v3123_v62, %v3078_v46 }
 0x1cd   : > { %1282 = vrot.lane.b32.xlu0 %v1243_v47, %s2703_s12  ;;  %v756_v43 = vadd.f32 %v3301_v15, %v611_v28  ;;  %v722_v47 = vsel %vm717_vm5, %v3222_v33, %v3289_v48  ;;  %v885_v33 = vsel %vm880_vm6, %v3291_v51, %v3310_v22  ;;  %v3486_v22 = vsel %vm935_vm8, %v3478_v12, %v3464_v30 }
 0x1ce   : > { %v3427_v5 = vpop.permute.xlu0 %850  ;;  %v754_v25 = vadd.f32 %v722_v47, %v609_v34  ;;  %v918_v48 = vadd.f32 %v885_v33, %v755_v9  ;;  %v4062_v47 = vld [vmem:[#allocation7_spill] sm:$0xff] }
 0x1cf   : > { %1284 = vrot.lane.b32.xlu1 %v1244_v11, %s2703_s12  ;;  %v3437_v8 = vpop.permute.xlu1 %689  ;;  %v919_v29 = vadd.f32 %v886_v19, %v756_v43  ;;  %v4061_v19 = vld [vmem:[#allocation10_spill] sm:$0xff]  ;;  %v612_v34 = vmul.f32 0.0, %v4062_v47 }
 0x1d0   : > { %v917_v15 = vadd.f32 %v3291_v51, %v754_v25  ;;  %v947_v51 = vmul.f32 %v3486_v22, %v918_v48  ;;  %v724_v43 = vsel %vm717_vm5, %v4061_v19, %v3324_v63  ;;  %v718_v25 = vsel %vm717_vm5, %v4063_v2, %v3425_v7 }
 0x1d1   : > { %1286 = vrot.lane.b32.xlu0 %v1245_v31, %s2703_s12  ;;  %v948_v1 = vmul.f32 %v3464_v30, %v919_v29  ;;  %v757_v9 = vadd.f32 %v724_v43, %v612_v34  ;;  %v613_v48 = vmul.f32 %v4062_v47, %v3109_v55  ;;  %v4066_v55 = vld [vmem:[#allocation6_spill] sm:$0xff] }
 0x1d2   : > { %v3431_v57 = vpop.permute.xlu0 %703  ;;  %v946_v52 = vmul.f32 %v3478_v12, %v917_v15 }
 0x1d3   : > { %1744 = vrot.lane.b32.xlu1 %v1705_v17, %s2704_s13 }
 0x1d5   : > { %1746 = vrot.lane.b32.xlu0 %v1706_v3, %s2704_s13 }
 0x1d6   : > { %v3435_v39 = vpop.permute.xlu0 %864 }
 0x1d7   : > { %1748 = vrot.lane.b32.xlu1 %v1707_v23, %s2704_s13 }
 0x1da   : > { %v3439_v4 = vpop.permute.xlu0 %854 }
 0x1e0   : > { %v3441_v59 = vpop.permute.xlu1 %1831 }
 0x1e4   : > { %v3445_v36 = vpop.permute.xlu1 %852 }
 0x1ea   : > { %v3449_v50 = vpop.permute.xlu1 %1276 }
 0x1f5   : > { %v3443_v45 = vpop.permute.xlu0 %1278  ;;  %v3453_v16 = vpop.permute.xlu1 %1280 }
 0x1f6   : > { %v1313_v34 = vsel %vm1312_vm9, %v3449_v50, %v3443_v45 }
 0x1f9   : > { %v3447_v21 = vpop.permute.xlu0 %1738  ;;  %v3466_v46 = vpop.permute.xlu1 %1740 }
 0x210   : > { %v1289_v41 = vpop.permute.xlu0 %1288 }
 0x219   : > { %v1293_v60 = vpop.permute.xlu0 %1292  ;;  %v1291_v27 = vpop.permute.xlu1 %1290 }
 0x21a   : > { %v1351_v26 = vadd.f32 %v1293_v60, %v948_v1  ;;  %v1317_v31 = vsel %vm1312_vm9, %v1289_v41, %v1291_v27  ;;  %v1318_v20 = vsel %vm1312_vm9, %v1291_v27, %v1293_v60  ;;  %v725_v27 = vsel %vm717_vm5, %v3324_v63, %v3431_v57 }
 0x21b   : > { %v1349_v37 = vadd.f32 %v1317_v31, %v946_v52  ;;  %v1350_v3 = vadd.f32 %v1318_v20, %v947_v51  ;;  %v887_v20 = vsel %vm880_vm6, %v3328_v53, %v3435_v39  ;;  %v920_v51 = vadd.f32 %v3328_v53, %v757_v9 }
 0x21d   : > { %v1751_v42 = vpop.permute.xlu0 %1750 }
 0x221   : > { %v1755_v11 = vpop.permute.xlu0 %1754 }
 0x222   : > { %v1813_v58 = vadd.f32 %v1755_v11, %v1351_v26  ;;  %v614_v26 = vmul.f32 %v4062_v47, %v3139_v44  ;;  %v719_v44 = vsel %vm717_vm5, %v3425_v7, %v3417_v32 }
 0x224   : > { %v3482_v62 = vadd.f32 %v4060_v35, %v1813_v58  ;;  %v1295_v49 = vpop.permute.xlu1 %1294  ;;  %v759_v63 = vadd.f32 %v3431_v57, %v614_v26  ;;  %v881_v57 = vsel %vm880_vm6, %v3429_v13, %v3419_v61 }
 0x226   : > { %v1928_v17 = vmul.f32 %v3482_v62, %v3482_v62 }
 0x228   : > { %1942 = vrot.lane.b32.xlu0 %v1928_v17, %s2705_s16  ;;  %v1753_v23 = vpop.permute.xlu1 %1752  ;;  %v758_v17 = vadd.f32 %v725_v27, %v613_v48 }
 0x229   : > { %v1779_v28 = vsel %vm1774_vm10, %v1751_v42, %v1753_v23  ;;  %v1780_v41 = vsel %vm1774_vm10, %v1753_v23, %v1755_v11  ;;  %v4064_v42 = vld [vmem:[#allocation8_spill] sm:$0xff] }
 0x22a   : > { %v1811_v60 = vadd.f32 %v1779_v28, %v1349_v37  ;;  %v1812_v29 = vadd.f32 %v1780_v41, %v1350_v3  ;;  %v603_v33 = vmul.f32 0.0, %v4064_v42  ;;  %v604_v52 = vmul.f32 %v4064_v42, %v4066_v55 }
 0x22b   : > { %v605_v7 = vmul.f32 %v4064_v42, %v3010_v38  ;;  %v882_v41 = vsel %vm880_vm6, %v3419_v61, %v3433_v10  ;;  %v921_v19 = vadd.f32 %v887_v20, %v758_v17  ;;  %v949_v38 = vmul.f32 %v3478_v12, %v920_v51 }
 0x22c   : > { %v3505_v18 = vadd.f32 %v4060_v35, %v1811_v60  ;;  %v3508_v1 = vadd.f32 %v4060_v35, %v1812_v29  ;;  %v748_v58 = vadd.f32 %v718_v25, %v603_v33  ;;  %v4065_v35 = vld [vmem:[#allocation12_spill] sm:$0xff]  ;;  %v749_v23 = vadd.f32 %v719_v44, %v604_v52  ;;  %v4067_v44 = vld [vmem:[#allocation11_spill] sm:$0xff] }
 0x22d   : > { %v888_v31 = vsel %vm880_vm6, %v3435_v39, %v4065_v35  ;;  %v750_v53 = vadd.f32 %v3417_v32, %v605_v7  ;;  %v950_v32 = vmul.f32 %v3486_v22, %v921_v19  ;;  %v1775_v42 = vsel %vm1774_vm10, %v3447_v21, %v3466_v46 }
 0x22e   : > { %v1927_v11 = vmul.f32 %v3508_v1, %v3508_v1  ;;  %v1926_v15 = vmul.f32 %v3505_v18, %v3505_v18  ;;  %v922_v39 = vadd.f32 %v888_v31, %v759_v63  ;;  %v911_v28 = vadd.f32 %v3429_v13, %v748_v58 }
 0x22f   : > { %v912_v60 = vadd.f32 %v881_v57, %v749_v23  ;;  %v913_v47 = vadd.f32 %v882_v41, %v750_v53  ;;  %v720_v41 = vsel %vm717_vm5, %v3421_v0, %v3437_v8  ;;  %v4068_v53 = vld [vmem:[#allocation14_spill] sm:$0xff] }
 0x230   : > { %1940 = vrot.lane.b32.xlu1 %v1927_v11, %s2705_s16  ;;  %1938 = vrot.lane.b32.xlu0 %v1926_v15, %s2705_s16  ;;  %v951_v13 = vmul.f32 %v3464_v30, %v922_v39  ;;  %v940_v61 = vmul.f32 %v3478_v12, %v911_v28  ;;  %v608_v0 = vmul.f32 %v4068_v53, %v3038_v56 }
 0x231   : > { %v1297_v37 = vpop.permute.xlu0 %1296  ;;  %v1299_v3 = vpop.permute.xlu1 %1298  ;;  %v941_v26 = vmul.f32 %v3486_v22, %v912_v60  ;;  %v942_v48 = vmul.f32 %v3464_v30, %v913_v47  ;;  %v721_v47 = vsel %vm717_vm5, %v3437_v8, %v3423_v54  ;;  %v883_v56 = vsel %vm880_vm6, %v3427_v5, %v3445_v36 }
 0x232   : > { %v1319_v43 = vsel %vm1312_vm9, %v1295_v49, %v1297_v37  ;;  %v1320_v2 = vsel %vm1312_vm9, %v1297_v37, %v1299_v3  ;;  %v1314_v49 = vsel %vm1312_vm9, %v3443_v45, %v3453_v16  ;;  %v1354_v33 = vadd.f32 %v1299_v3, %v951_v13 }
 0x233   : > { %v1352_v10 = vadd.f32 %v1319_v43, %v949_v38  ;;  %v1343_v9 = vadd.f32 %v1313_v34, %v940_v61  ;;  %v1353_v27 = vadd.f32 %v1320_v2, %v950_v32  ;;  %v1344_v31 = vadd.f32 %v1314_v49, %v941_v26 }
 0x234   : > { %v1345_v55 = vadd.f32 %v3453_v16, %v942_v48  ;;  %v606_v43 = vmul.f32 0.0, %v4068_v53  ;;  %v607_v34 = vmul.f32 %v4068_v53, %v3030_v6  ;;  %v884_v2 = vsel %vm880_vm6, %v3445_v36, %v3439_v4  ;;  %v328_v36 = vld [vmem:[%s4017_s1 + $0x20] sm:$0xff] }
 0x235   : > { %v1757_v29 = vpop.permute.xlu1 %1756  ;;  %v1805_v45 = vadd.f32 %v1775_v42, %v1343_v9  ;;  %2494 = vmatmul.mubr.msk.f32.gmra.mrb[8].mxu0 %vm366_vm0, %v328_v36 }
 0x236   : > { %v751_v38 = vadd.f32 %v720_v41, %v606_v43  ;;  %v752_v32 = vadd.f32 %v721_v47, %v607_v34 }
 0x237   : > { %v1759_v25 = vpop.permute.xlu0 %1758  ;;  %v3581_v7 = vadd.f32 %v3441_v59, %v1805_v45 }
 0x238   : > { %v1781_v50 = vsel %vm1774_vm10, %v1757_v29, %v1759_v25  ;;  %v914_v13 = vadd.f32 %v3427_v5, %v751_v38  ;;  %v915_v42 = vadd.f32 %v883_v56, %v752_v32 }
 0x239   : > { %v1814_v11 = vadd.f32 %v1781_v50, %v1352_v10  ;;  %v1761_v15 = vpop.permute.xlu1 %1760  ;;  %v1877_v28 = vmul.f32 %v3581_v7, %v3581_v7  ;;  %v753_v10 = vadd.f32 %v3423_v54, %v608_v0 }
 0x23a   : > { %v1782_v58 = vsel %vm1774_vm10, %v1759_v25, %v1761_v15  ;;  %v1816_v35 = vadd.f32 %v1761_v15, %v1354_v33  ;;  %v943_v6 = vmul.f32 %v3478_v12, %v914_v13 }
 0x23b   : > { %v3567_v63 = vadd.f32 %v4067_v44, %v1814_v11  ;;  %v1815_v21 = vadd.f32 %v1782_v58, %v1353_v27  ;;  %v1743_v20 = vpop.permute.xlu0 %1742  ;;  %v916_v49 = vadd.f32 %v884_v2, %v753_v10  ;;  %v944_v27 = vmul.f32 %v3486_v22, %v915_v42 }
 0x23c   : > { %v1776_v52 = vsel %vm1774_vm10, %v3466_v46, %v1743_v20  ;;  %v3578_v37 = vadd.f32 %v4067_v44, %v1816_v35  ;;  %v1807_v57 = vadd.f32 %v1743_v20, %v1345_v55  ;;  %v4069_v35 = vmov 0.0  }
 0x23d   : > { %v1929_v51 = vmul.f32 %v3567_v63, %v3567_v63  ;;  %v3575_v17 = vadd.f32 %v4067_v44, %v1815_v21  ;;  %v1806_v3 = vadd.f32 %v1776_v52, %v1344_v31  ;;  %v945_v4 = vmul.f32 %v3464_v30, %v916_v49  ;;  %479 = vmatprep.mubr.f32.mxu0 %v4069_v35 }
 0x23e   : > { %v1931_v39 = vmul.f32 %v3578_v37, %v3578_v37  ;;  %v3593_v23 = vadd.f32 %v3441_v59, %v1807_v57 }
 0x23f   : > { %1944 = vrot.lane.b32.xlu1 %v1929_v51, %s2705_s16  ;;  %v1930_v16 = vmul.f32 %v3575_v17, %v3575_v17  ;;  %v3587_v46 = vadd.f32 %v3441_v59, %v1806_v3  ;;  %v1283_v60 = vpop.permute.xlu0 %1282 }
 0x240   : > { %v1879_v59 = vmul.f32 %v3593_v23, %v3593_v23 }
 0x241   : > { %1946 = vrot.lane.b32.xlu0 %v1930_v16, %s2705_s16  ;;  %v1878_v19 = vmul.f32 %v3587_v46, %v3587_v46 }
 0x243   : > { %1948 = vrot.lane.b32.xlu1 %v1931_v39, %s2705_s16  ;;  %v1287_v61 = vpop.permute.xlu0 %1286 }
 0x244   : > { %v1348_v11 = vadd.f32 %v1287_v61, %v945_v4 }
 0x245   : > { %1889 = vrot.lane.b32.xlu0 %v1877_v28, %s2705_s16 }
 0x247   : > { %1891 = vrot.lane.b32.xlu1 %v1878_v19, %s2705_s16  ;;  %v1747_v33 = vpop.permute.xlu0 %1746 }
 0x249   : > { %1893 = vrot.lane.b32.xlu0 %v1879_v59, %s2705_s16 }
 0x24a   : > { %v1837_v29 = vpop.permute.xlu1 %1836 }
 0x24e   : > { %v1285_v25 = vpop.permute.xlu1 %1284 }
 0x24f   : > { %v1315_v8 = vsel %vm1312_vm9, %v1283_v60, %v1285_v25  ;;  %v1316_v26 = vsel %vm1312_vm9, %v1285_v25, %v1287_v61 }
 0x250   : > { %v1346_v50 = vadd.f32 %v1315_v8, %v943_v6  ;;  %v1347_v15 = vadd.f32 %v1316_v26, %v944_v27 }
 0x252   : > { %v1745_v9 = vpop.permute.xlu1 %1744 }
 0x253   : > { %v1777_v54 = vsel %vm1774_vm10, %v1745_v9, %v1747_v33 }
 0x254   : > { %v1808_v5 = vadd.f32 %v1777_v54, %v1346_v50 }
 0x256   : > { %v3634_v48 = vadd.f32 %v1837_v29, %v1808_v5  ;;  %v1749_v58 = vpop.permute.xlu1 %1748 }
 0x257   : > { %v1778_v31 = vsel %vm1774_vm10, %v1747_v33, %v1749_v58  ;;  %v1810_v45 = vadd.f32 %v1749_v58, %v1348_v11 }
 0x258   : > { %v1880_v44 = vmul.f32 %v3634_v48, %v3634_v48  ;;  %v1809_v21 = vadd.f32 %v1778_v31, %v1347_v15 }
 0x259   : > { %v3640_v20 = vadd.f32 %v1837_v29, %v1810_v45 }
 0x25a   : > { %v3642_v55 = vadd.f32 %v1837_v29, %v1809_v21  ;;  %1895 = vrot.lane.b32.xlu1 %v1880_v44, %s2705_s16 }
 0x25b   : > { %v1882_v52 = vmul.f32 %v3640_v20, %v3640_v20 }
 0x25c   : > { %v1881_v51 = vmul.f32 %v3642_v55, %v3642_v55 }
 0x25e   : > { %1897 = vrot.lane.b32.xlu0 %v1881_v51, %s2705_s16  ;;  %1899 = vrot.lane.b32.xlu1 %v1882_v52, %s2705_s16 }
 0x29a   : > { %v1943_v3 = vpop.permute.xlu0 %1942 }
 0x2a2   : > { %v1939_v57 = vpop.permute.xlu0 %1938  ;;  %v1941_v16 = vpop.permute.xlu1 %1940 }
 0x2a3   : > { %v1950_v39 = vsel %vm1901_vm11, %v1939_v57, %v1941_v16  ;;  %v1951_v28 = vsel %vm1901_vm11, %v1941_v16, %v1943_v3 }
 0x2a4   : > { %v1958_v41 = vadd.f32 %v1951_v28, %v1950_v39  ;;  %v334_v28 = vld [vmem:[%s4018_s2 + $0x20] sm:$0xff] }
 0x2a6   : > { %1959 = vadd.xlane.f32.xlu0 %v1958_v41  ;;  %v4072_v41 = vmov 5  }
 0x2b1   : > { %v1945_v19 = vpop.permute.xlu1 %1944 }
 0x2b3   : > { %v1947_v53 = vpop.permute.xlu0 %1946 }
 0x2b4   : > { %v1952_v60 = vsel %vm1901_vm11, %v1945_v19, %v1947_v53  ;;  %v335_v19 = vld [vmem:[%s4018_s2 + $0x28] sm:$0xff] }
 0x2b5   : > { %v1949_v43 = vpop.permute.xlu1 %1948 }
 0x2b6   : > { %v1953_v59 = vsel %vm1901_vm11, %v1947_v53, %v1949_v43  ;;  %v4073_v53 = vmov 7   ;;  %v4074_v43 = vmov 8  }
 0x2b7   : > { %v1961_v38 = vadd.f32 %v1953_v59, %v1952_v60  ;;  %v1890_v29 = vpop.permute.xlu0 %1889  ;;  %v4075_v60 = vmov 3   ;;  %v4076_v59 = vmov 6  }
 0x2b9   : > { %1962 = vadd.xlane.f32.xlu1 %v1961_v38  ;;  %v1892_v0 = vpop.permute.xlu1 %1891  ;;  %v4077_v38 = vmov 1  }
 0x2ba   : > { %v1902_v34 = vsel %vm1901_vm11, %v1890_v29, %v1892_v0  ;;  %v4078_v29 = vmov 2  }
 0x2bb   : > { %v1894_v47 = vpop.permute.xlu0 %1893 }
 0x2bc   : > { %v1903_v13 = vsel %vm1901_vm11, %v1892_v0, %v1894_v47 }
 0x2bd   : > { %v1910_v2 = vadd.f32 %v1903_v13, %v1902_v34 }
 0x2bf   : > { %1911 = vadd.xlane.f32.xlu0 %v1910_v2 }
 0x2cc   : > { %v1896_v61 = vpop.permute.xlu1 %1895 }
 0x2d0   : > { %v1898_v10 = vpop.permute.xlu0 %1897  ;;  %v1900_v56 = vpop.permute.xlu1 %1899 }
 0x2d1   : > { %v1904_v32 = vsel %vm1901_vm11, %v1896_v61, %v1898_v10  ;;  %v1905_v25 = vsel %vm1901_vm11, %v1898_v10, %v1900_v56 }
 0x2d2   : > { %v1913_v49 = vadd.f32 %v1905_v25, %v1904_v32 }
 0x2d4   : > { %1914 = vadd.xlane.f32.xlu0 %v1913_v49 }
 0x308   : > { %v3675_v21 = vpop.f32.mrb[8].mxu0 }
 0x309   : > { %v3677_v51 = vpop.f32.mrb[9].mxu0 }
 0x333   : > { %v1960_v8 = vpop.xlane.xlu0 %1959 }
 0x334   : > { %v1964_v42 = vmax.f32 %v1960_v8, 1e-24 }
 0x336   : > { %2645 = vrsqrt.f32 %v1964_v42 }
 0x340   : > { %v2646_v6 = vpop.eup %2645 }
 0x341   : > { %v1969_v33 = vmul.f32 %v2646_v6, %v3508_v1  ;;  %v1970_v50 = vmul.f32 %v2646_v6, %v3482_v62  ;;  %v1968_v15 = vmul.f32 %v2646_v6, %v3505_v18  ;;  %v329_v62 = vld [vmem:[%s4017_s1 + $0x28] sm:$0xff] }
 0x342   : > { %2495 = vmatmul.mubr.msk.f32.gmra.mrb[10].mxu0 %vm366_vm0, %v329_v62 }
 0x343   : > { %v2596_v9 = vpack.i.bf16 %v1970_v50, %v1969_v33 }
 0x345   : > { %2597 = vrot.lane.b32.xlu1 %v2596_v9, %s2705_s16 }
 0x346   : > { %v1963_v4 = vpop.xlane.xlu1 %1962 }
 0x347   : > { %v1965_v26 = vmax.f32 %v1963_v4, 1e-24 }
 0x349   : > { %2647 = vrsqrt.f32 %v1965_v26 }
 0x34c   : > { %v1912_v54 = vpop.xlane.xlu0 %1911 }
 0x34d   : > { %v1916_v27 = vmax.f32 %v1912_v54, 1e-24 }
 0x34f   : > { %2649 = vrsqrt.f32 %v1916_v27 }
 0x353   : > { %v2648_v5 = vpop.eup %2647 }
 0x354   : > { %v1972_v36 = vmul.f32 %v2648_v5, %v3575_v17  ;;  %v1973_v11 = vmul.f32 %v2648_v5, %v3578_v37  ;;  %v1971_v1 = vmul.f32 %v2648_v5, %v3567_v63 }
 0x356   : > { %v2601_v58 = vpack.i.bf16 %v1973_v11, %v1972_v36  ;;  %v2606_v31 = vpack.i.bf16 %v1971_v1, %v1968_v15 }
 0x358   : > { %2602 = vrot.lane.b32.xlu0 %v2601_v58, %s2705_s16  ;;  %2607 = vrot.lane.b32.xlu1 %v2606_v31, %s2705_s16 }
 0x359   : > { %v2650_v45 = vpop.eup %2649 }
 0x35a   : > { %v1921_v17 = vmul.f32 %v2650_v45, %v3587_v46  ;;  %v1922_v37 = vmul.f32 %v2650_v45, %v3593_v23  ;;  %v1920_v3 = vmul.f32 %v2650_v45, %v3581_v7  ;;  %v3691_v7 = vld [vmem:[%s4019_s3 + $0x28] sm:$0xff] }
 0x35c   : > { %v2611_v18 = vpack.i.bf16 %v1922_v37, %v1921_v17 }
 0x35e   : > { %2612 = vrot.lane.b32.xlu1 %v2611_v18, %s2705_s16 }
 0x361   : > { %v1915_v63 = vpop.xlane.xlu0 %1914 }
 0x362   : > { %v1917_v44 = vmax.f32 %v1915_v63, 1e-24 }
 0x364   : > { %2651 = vrsqrt.f32 %v1917_v44 }
 0x36e   : > { %v2652_v52 = vpop.eup %2651 }
 0x36f   : > { %v1924_v57 = vmul.f32 %v2652_v52, %v3642_v55  ;;  %v1923_v16 = vmul.f32 %v2652_v52, %v3634_v48  ;;  %v1925_v46 = vmul.f32 %v2652_v52, %v3640_v20  ;;  %v3697_v48 = vld [vmem:[%s4019_s3 + $0x20] sm:$0xff]  ;;  %v4070_v20 = vmov 4  }
 0x370   : > { %v4071_v55 = vmov 0  }
 0x371   : > { %v2616_v23 = vpack.i.bf16 %v1924_v57, %v1920_v3  ;;  %v2621_v39 = vpack.i.bf16 %v1923_v16, %v1925_v46 }
 0x373   : > { %2617 = vrot.lane.b32.xlu0 %v2616_v23, %s2705_s16  ;;  %2622 = vrot.lane.b32.xlu1 %v2621_v39, %s2705_s16 }
 0x377   : > { %358 = vperm.xlu1 %2590, %v334_v28   ;;  %1135 = vperm.xlu0 %2633, %v3691_v7  }
 0x37b   : > { %2626 = vset.pattern.permute.xlu1 %v4070_v20  ;;  %2643 = vset.pattern.permute.xlu0 %v4071_v55 }
 0x37c   : > { %1017 = vperm.xlu1 %2626, %v3697_v48  }
 0x380   : > { %2627 = vset.pattern.permute.xlu1 %v4072_v41 }
 0x381   : > { %1420 = vperm.xlu1 %2627, %v3697_v48  }
 0x385   : > { %2628 = vset.pattern.permute.xlu1 %v4071_v55 }
 0x386   : > { %363 = vperm.xlu1 %2628, %v335_v19  }
 0x38a   : > { %2629 = vset.pattern.permute.xlu1 %v4073_v53 }
 0x38b   : > { %1131 = vperm.xlu1 %2629, %v3697_v48  }
 0x38f   : > { %2630 = vset.pattern.permute.xlu1 %v4074_v43 }
 0x390   : > { %1564 = vperm.xlu1 %2630, %v3697_v48  }
 0x394   : > { %2631 = vset.pattern.permute.xlu1 %v4070_v20 }
 0x395   : > { %1021 = vperm.xlu1 %2631, %v3691_v7  }
 0x399   : > { %2632 = vset.pattern.permute.xlu1 %v4072_v41 }
 0x39a   : > { %1424 = vperm.xlu1 %2632, %v3691_v7  }
 0x39e   : > { %2634 = vset.pattern.permute.xlu1 %v4074_v43 }
 0x39f   : > { %1568 = vperm.xlu1 %2634, %v3691_v7  }
 0x3a3   : > { %2635 = vset.pattern.permute.xlu1 %v4075_v60 }
 0x3a4   : > { %638 = vperm.xlu1 %2635, %v3697_v48  }
 0x3a8   : > { %2636 = vset.pattern.permute.xlu1 %v4076_v59 }
 0x3a9   : > { %801 = vperm.xlu1 %2636, %v3697_v48  }
 0x3ad   : > { %2637 = vset.pattern.permute.xlu1 %v4077_v38 }
 0x3ae   : > { %975 = vperm.xlu1 %2637, %v3697_v48  }
 0x3b2   : > { %2638 = vset.pattern.permute.xlu1 %v4078_v29 }
 0x3b3   : > { %1378 = vperm.xlu1 %2638, %v3697_v48  }
 0x3b7   : > { %2639 = vset.pattern.permute.xlu1 %v4075_v60  ;;  %v2598_v0 = vpop.permute.xlu1 %2597 }
 0x3b8   : > { %642 = vperm.xlu1 %2639, %v3691_v7   ;;  %v2600_v47 = vunpack.i.h.bf16 %v2598_v0  ;;  %v2599_v34 = vunpack.i.l.bf16 %v2598_v0 }
 0x3ba   : > { %v2019_v25 = vsel %vm1901_vm11, %v2599_v34, %v2600_v47 }
 0x3bc   : > { %2640 = vset.pattern.permute.xlu1 %v4076_v59 }
 0x3bd   : > { %805 = vperm.xlu1 %2640, %v3691_v7  }
 0x3c1   : > { %2641 = vset.pattern.permute.xlu1 %v4077_v38 }
 0x3c2   : > { %979 = vperm.xlu1 %2641, %v3691_v7  }
 0x3c6   : > { %2642 = vset.pattern.permute.xlu1 %v4078_v29 }
 0x3c7   : > { %1382 = vperm.xlu1 %2642, %v3691_v7  }
 0x3ca   : > { %v2603_v13 = vpop.permute.xlu0 %2602  ;;  %v2608_v2 = vpop.permute.xlu1 %2607 }
 0x3cb   : > { %v2605_v61 = vunpack.i.h.bf16 %v2603_v13  ;;  %v2604_v10 = vunpack.i.l.bf16 %v2603_v13  ;;  %v2610_v56 = vunpack.i.h.bf16 %v2608_v2  ;;  %v2609_v32 = vunpack.i.l.bf16 %v2608_v2  ;;  %2644 = vset.pattern.permute.xlu1 %v4071_v55 }
 0x3cd   : > { %v2021_v49 = vsel %vm1901_vm11, %v2604_v10, %v2605_v61  ;;  %v2018_v8 = vsel %vm1901_vm11, %v2609_v32, %v2599_v34  ;;  %v2020_v42 = vsel %vm1901_vm11, %v2610_v56, %v2604_v10 }
 0x3ce   : > { %v2513_v6 = vpack.c.bf16 %v2021_v49, %v2019_v25  ;;  %v2515_v33 = vpack.c.bf16 %v2020_v42, %v2018_v8 }
 0x3d0   : > { %v2613_v50 = vpop.permute.xlu1 %2612  ;;  %2514 = vmatprep.subr.bf16.mxu1 %v2513_v6 }
 0x3d1   : > { %v2615_v9 = vunpack.i.h.bf16 %v2613_v50  ;;  %v2614_v4 = vunpack.i.l.bf16 %v2613_v50  ;;  %2516 = vmatpush1.bf16.xpose.msra.mxu1 %v2515_v33 }
 0x3d3   : > { %v1993_v26 = vsel %vm1901_vm11, %v2614_v4, %v2615_v9 }
 0x3d4   : > { %2090 = vmatprep.mubr.f32.mxu1 %v1993_v26  ;;  %v2204_v26 = vstv %s2501_s14 }
 0x3e5   : > { %v2618_v54 = vpop.permute.xlu0 %2617  ;;  %v2623_v27 = vpop.permute.xlu1 %2622 }
 0x3e6   : > { %v2620_v5 = vunpack.i.h.bf16 %v2618_v54  ;;  %v2619_v36 = vunpack.i.l.bf16 %v2618_v54  ;;  %v2624_v11 = vunpack.i.l.bf16 %v2623_v27  ;;  %v2625_v15 = vunpack.i.h.bf16 %v2623_v27 }
 0x3e8   : > { %v1992_v1 = vsel %vm1901_vm11, %v2619_v36, %v2614_v4  ;;  %v1995_v62 = vsel %vm1901_vm11, %v2620_v5, %v2624_v11  ;;  %v1994_v58 = vsel %vm1901_vm11, %v2625_v15, %v2620_v5 }
 0x3e9   : > { %2091 = vmatmul.mubr.f32.vlgmr.msra.gmra.mrb[0].mxu1 %v1992_v1 }
 0x3ea   : > { %2095 = vmatprep.mubr.f32.mxu1 %v1995_v62 }
 0x3ed   : > { %2096 = vmatmul.mubr.f32.gmra.mrb[2].mxu1 %v1994_v58 }
 0x3ee   : > { %2196 = vmatprep.mubr.f32.mxu1 %v4069_v35 }
 0x3f6   : > { %v359_v31 = vpop.permute.xlu1 %358  ;;  %v1136_v34 = vpop.permute.xlu0 %1135 }
 0x3f7   : > { %v3745_v45 = vadd.f32 %v3675_v21, %v359_v31  ;;  %v3748_v17 = vadd.f32 %v3677_v51, %v359_v31  ;;  %v1155_v33 = vmul.f32 0.0, %v1136_v34 }
 0x3fb   : > { %v1018_v37 = vpop.permute.xlu1 %1017 }
 0x3fc   : > { %v1032_v18 = vmul.f32 %v1018_v37, %v3745_v45  ;;  %v1033_v63 = vmul.f32 %v1018_v37, %v3748_v17 }
 0x3fe   : > { %1066 = vrot.lane.b32.xlu0 %v1033_v63, %s2701_s26  ;;  %1064 = vrot.lane.b32.xlu1 %v1032_v18, %s2701_s26 }
 0x400   : > { %v1421_v44 = vpop.permute.xlu1 %1420 }
 0x401   : > { %v1439_v52 = vmul.f32 %v1421_v44, %v3745_v45  ;;  %v1441_v3 = vmul.f32 0.0, %v1421_v44  ;;  %v1440_v11 = vmul.f32 %v1421_v44, %v3748_v17 }
 0x403   : > { %1487 = vrot.lane.b32.xlu1 %v1439_v52, %s2701_s26 }
 0x405   : > { %v364_v21 = vpop.permute.xlu1 %363 }
 0x407   : > { %1491 = vrot.lane.b32.xlu1 %v1441_v3, %s2701_s26 }
 0x40a   : > { %v1132_v51 = vpop.permute.xlu1 %1131 }
 0x40b   : > { %v1151_v57 = vmul.f32 %v1132_v51, %v3748_v17  ;;  %v1150_v15 = vmul.f32 %v1132_v51, %v3745_v45  ;;  %v1152_v1 = vmul.f32 0.0, %v1132_v51  ;;  %v1827_v51 = vld [vmem:[%s4020_s4 + $0x20] sm:$0xff] }
 0x40d   : > { %1200 = vrot.lane.b32.xlu1 %v1151_v57, %s2702_s29 }
 0x40f   : > { %v1565_v16 = vpop.permute.xlu1 %1564 }
 0x410   : > { %v1583_v46 = vmul.f32 %v1565_v16, %v3745_v45  ;;  %v1585_v23 = vmul.f32 0.0, %v1565_v16  ;;  %v1584_v62 = vmul.f32 %v1565_v16, %v3748_v17 }
 0x412   : > { %1631 = vrot.lane.b32.xlu1 %v1583_v46, %s2702_s29 }
 0x414   : > { %v1022_v55 = vpop.permute.xlu1 %1021 }
 0x415   : > { %v481_v39 = vpop.f32.mrb[10].mxu0 }
 0x416   : > { %1635 = vrot.lane.b32.xlu1 %v1585_v23, %s2702_s29  ;;  %v483_v28 = vpop.f32.mrb[11].mxu0  ;;  %v3794_v42 = vadd.f32 %v481_v39, %v364_v21 }
 0x417   : > { %v3762_v20 = vadd.f32 %v483_v28, %v364_v21 }
 0x418   : > { %v1153_v6 = vmul.f32 %v1136_v34, %v3794_v42  ;;  %v1034_v58 = vmul.f32 %v1022_v55, %v3794_v42 }
 0x419   : > { %v1035_v41 = vmul.f32 %v1022_v55, %v3762_v20  ;;  %v1425_v19 = vpop.permute.xlu1 %1424  ;;  %v1154_v18 = vmul.f32 %v1136_v34, %v3762_v20 }
 0x41a   : > { %v1443_v8 = vmul.f32 %v1425_v19, %v3762_v20  ;;  %v1442_v31 = vmul.f32 %v1425_v19, %v3794_v42  ;;  %v1444_v37 = vmul.f32 0.0, %v1425_v19 }
 0x41b   : > { %1070 = vrot.lane.b32.xlu1 %v1035_v41, %s2701_s26 }
 0x41e   : > { %v1569_v53 = vpop.permute.xlu1 %1568 }
 0x41f   : > { %1495 = vrot.lane.b32.xlu1 %v1443_v8, %s2701_s26  ;;  %v1587_v50 = vmul.f32 %v1569_v53, %v3762_v20  ;;  %v1586_v63 = vmul.f32 %v1569_v53, %v3794_v42  ;;  %v1588_v44 = vmul.f32 0.0, %v1569_v53 }
 0x423   : > { %v3766_v43 = vpop.permute.xlu1 %638  ;;  %1204 = vrot.lane.b32.xlu1 %v1153_v6, %s2702_s29 }
 0x424   : > { %v658_v52 = vmul.f32 %v3766_v43, %v3745_v45 }
 0x427   : > { %1208 = vrot.lane.b32.xlu1 %v1155_v33, %s2702_s29 }
 0x428   : > { %v3768_v60 = vpop.permute.xlu1 %801 }
 0x429   : > { %v821_v3 = vmul.f32 %v3768_v60, %v3748_v17 }
 0x42b   : > { %1639 = vrot.lane.b32.xlu1 %v1587_v50, %s2702_s29 }
 0x42d   : > { %v3770_v59 = vpop.permute.xlu1 %975 }
 0x42e   : > { %v994_v2 = vmul.f32 0.0, %v3770_v59  ;;  %v995_v61 = vmul.f32 %v3770_v59, %v3745_v45 }
 0x432   : > { %v3772_v38 = vpop.permute.xlu1 %1378 }
 0x433   : > { %v1399_v55 = vmul.f32 %v3772_v38, %v3748_v17 }
 0x437   : > { %v3774_v29 = vpop.permute.xlu1 %642 }
 0x438   : > { %v661_v21 = vmul.f32 %v3774_v29, %v3794_v42 }
 0x43c   : > { %v3776_v0 = vpop.permute.xlu1 %805 }
 0x43d   : > { %v825_v57 = vmul.f32 0.0, %v3776_v0 }
 0x441   : > { %v3778_v47 = vpop.permute.xlu1 %979 }
 0x446   : > { %v3780_v13 = vpop.permute.xlu1 %1382 }
 0x470   : > { %v3785_v10 = vpop.permute.xlu0 %1066  ;;  %v1065_v56 = vpop.permute.xlu1 %1064 }
 0x471   : > { %v1076_v32 = vsel %vm717_vm5, %v1065_v56, %v3785_v10  ;;  %v3789_v25 = vadd.f32 %v1065_v56, %v994_v2 }
 0x472   : > { %v3791_v49 = vadd.f32 %v1076_v32, %v995_v61  ;;  %v996_v32 = vmul.f32 %v3770_v59, %v3748_v17 }
 0x474   : > { %v1110_v6 = vadd.f32 %v3785_v10, %v996_v32 }
 0x475   : > { %v3839_v16 = vpop.permute.xlu1 %1487 }
 0x479   : > { %v1492_v46 = vpop.permute.xlu1 %1491 }
 0x47f   : > { %v1201_v53 = vpop.permute.xlu1 %1200 }
 0x484   : > { %v3852_v33 = vpop.permute.xlu1 %1631 }
 0x4bc   : > { %v3802_v9 = vpop.f32.mrb[0].mxu1 }
 0x4bd   : > { %v2094_v4 = vpop.f32.mrb[1].mxu1 }
 0x4c0   : > { %v2097_v54 = vpop.f32.mrb[2].mxu1 }
 0x4c1   : > { %v2205_v27 = vmul.f32 %v2204_v26, %v2097_v54  ;;  %v2099_v5 = vpop.f32.mrb[3].mxu1  ;;  %v1398_v54 = vmul.f32 %v3772_v38, %v3745_v45 }
 0x4c2   : > { %v1636_v5 = vpop.permute.xlu1 %1635 }
 0x4c3   : > { %v2207_v36 = vsel %vm2206_vm12, %v2205_v27, -inf }
 0x4c4   : > { %2208 = vmax.xlane.f32.xlu0 %v2207_v36 }
 0x4da   : > { %1489 = vrot.lane.b32.xlu0 %v1440_v11, %s2701_s26 }
 0x4de   : > { %1198 = vrot.lane.b32.xlu0 %v1150_v15, %s2702_s29 }
 0x4e2   : > { %1202 = vrot.lane.b32.xlu0 %v1152_v1, %s2702_s29 }
 0x4e6   : > { %1633 = vrot.lane.b32.xlu0 %v1584_v62, %s2702_s29 }
 0x4ea   : > { %1068 = vrot.lane.b32.xlu0 %v1034_v58, %s2701_s26  ;;  %v1071_v58 = vpop.permute.xlu1 %1070 }
 0x4ee   : > { %1493 = vrot.lane.b32.xlu0 %v1442_v31, %s2701_s26  ;;  %v1828_v31 = vld [vmem:[%s4020_s4 + $0x28] sm:$0xff] }
 0x4f2   : > { %1497 = vrot.lane.b32.xlu0 %v1444_v37, %s2701_s26 }
 0x4f6   : > { %1206 = vrot.lane.b32.xlu0 %v1154_v18, %s2702_s29  ;;  %v3872_v18 = vpop.permute.xlu1 %1495 }
 0x4fa   : > { %1637 = vrot.lane.b32.xlu0 %v1586_v63, %s2702_s29  ;;  %v997_v63 = vmul.f32 0.0, %v3778_v47 }
 0x4fe   : > { %1641 = vrot.lane.b32.xlu0 %v1588_v44, %s2702_s29 }
 0x502   : > { %595 = vperm.xlu0 %2643, %v3697_v48   ;;  %v823_v48 = vmul.f32 %v3776_v0, %v3794_v42 }
 0x506   : > { %707 = vrot.lane.b32.xlu0 %v658_v52, %s2701_s26 }
 0x50a   : > { %870 = vrot.lane.b32.xlu0 %v821_v3, %s2702_s29  ;;  %v998_v3 = vmul.f32 %v3778_v47, %v3794_v42 }
 0x50e   : > { %713 = vrot.lane.b32.xlu0 %v661_v21, %s2701_s26 }
 0x512   : > { %1851 = vperm.xlu0 %2643, %v1827_v51  }
 0x516   : > { %874 = vrot.lane.b32.xlu0 %v823_v48, %s2702_s29  ;;  %v1205_v48 = vpop.permute.xlu1 %1204 }
 0x51a   : > { %878 = vrot.lane.b32.xlu0 %v825_v57, %s2702_s29 }
 0x551   : > { %v2209_v23 = vpop.xlane.xlu0 %2208 }
 0x552   : > { %v2210_v39 = vsub.f32 %v2205_v27, %v2209_v23 }
 0x554   : > { %v2211_v28 = vmul.f32 1.442695, %v2210_v39 }
 0x555   : > { %v1490_v41 = vpop.permute.xlu0 %1489 }
 0x556   : > { %2653 = vpow2.f32 %v2211_v28  ;;  %v1508_v19 = vsel %vm717_vm5, %v1490_v41, %v1492_v46  ;;  %v1507_v4 = vsel %vm717_vm5, %v3839_v16, %v1490_v41  ;;  %v2102_v28 = vstv %s2101_s22 }
 0x557   : > { %v1543_v34 = vadd.f32 %v1508_v19, %v1399_v55  ;;  %v1542_v59 = vadd.f32 %v1507_v4, %v1398_v54  ;;  %v2103_v55 = vmul.f32 %v2102_v28, %v3802_v9  ;;  %v659_v19 = vmul.f32 %v3766_v43, %v3748_v17 }
 0x558   : > { %v822_v9 = vmul.f32 0.0, %v3768_v60 }
 0x559   : > { %v1199_v2 = vpop.permute.xlu0 %1198  ;;  %v2105_v41 = vsel %vm2104_vm13, %v2103_v55, -inf }
 0x55a   : > { %v1218_v61 = vsel %vm880_vm6, %v1199_v2, %v1201_v53  ;;  %v3846_v56 = vadd.f32 %v1199_v2, %v3789_v25  ;;  %v660_v2 = vmul.f32 0.0, %v3774_v29 }
 0x55b   : > { %v1253_v8 = vadd.f32 %v1218_v61, %v3791_v49  ;;  %v1397_v61 = vmul.f32 0.0, %v3772_v38 }
 0x55d   : > { %v1203_v50 = vpop.permute.xlu0 %1202  ;;  %v1541_v32 = vadd.f32 %v3839_v16, %v1397_v61 }
 0x55e   : > { %v1219_v26 = vsel %vm880_vm6, %v1201_v53, %v1203_v50  ;;  %v657_v53 = vmul.f32 0.0, %v3766_v43  ;;  %v824_v43 = vmul.f32 %v3776_v0, %v3762_v20  ;;  %v999_v50 = vmul.f32 %v3778_v47, %v3762_v20 }
 0x55f   : > { %v1254_v25 = vadd.f32 %v1219_v26, %v1110_v6  ;;  %v1685_v6 = vadd.f32 %v3852_v33, %v1541_v32 }
 0x560   : > { %v3859_v27 = vpop.eup %2653  ;;  %v1113_v54 = vadd.f32 %v1071_v58, %v999_v50 }
 0x561   : > { %2214 = vrot.lane.b32.xlu1 %v3859_v27, %s2706_s19  ;;  %1304 = vrot.lane.b32.xlu0 %v1254_v25, %s2703_s12  ;;  %v1634_v10 = vpop.permute.xlu0 %1633  ;;  %v1714_v16 = vmul.f32 %v3256_v14, %v1685_v6 }
 0x562   : > { %v1651_v49 = vsel %vm880_vm6, %v3852_v33, %v1634_v10  ;;  %v1652_v36 = vsel %vm880_vm6, %v1634_v10, %v1636_v5 }
 0x563   : > { %v1686_v11 = vadd.f32 %v1651_v49, %v1542_v59  ;;  %v1687_v15 = vadd.f32 %v1652_v36, %v1543_v34  ;;  %v820_v34 = vmul.f32 %v3768_v60, %v3745_v45  ;;  %v1209_v60 = vpop.permute.xlu1 %1208 }
 0x565   : > { %v1715_v1 = vmul.f32 %v3271_v24, %v1686_v11  ;;  %v1069_v62 = vpop.permute.xlu0 %1068 }
 0x566   : > { %v1077_v52 = vsel %vm717_vm5, %v1069_v62, %v1071_v58  ;;  %v1111_v21 = vadd.f32 %v1069_v62, %v997_v63  ;;  %v1402_v58 = vmul.f32 %v3780_v13, %v3762_v20 }
 0x567   : > { %1764 = vrot.lane.b32.xlu0 %v1715_v1, %s2704_s13  ;;  %v1112_v51 = vadd.f32 %v1077_v52, %v998_v3  ;;  %v1640_v0 = vpop.permute.xlu1 %1639 }
 0x568   : > { %v1255_v39 = vadd.f32 %v1205_v48, %v1111_v21 }
 0x569   : > { %v1494_v37 = vpop.permute.xlu0 %1493 }
 0x56a   : > { %v1509_v38 = vsel %vm717_vm5, %v1494_v37, %v3872_v18 }
 0x56b   : > { %1856 = vperm.xlu0 %2643, %v1828_v31  }
 0x56d   : > { %v3875_v44 = vpop.permute.xlu0 %1497 }
 0x56e   : > { %v1510_v62 = vsel %vm717_vm5, %v3872_v18, %v3875_v44 }
 0x56f   : > { %v1546_v31 = vadd.f32 %v1510_v62, %v1402_v58 }
 0x571   : > { %v1207_v57 = vpop.permute.xlu0 %1206 }
 0x572   : > { %v1220_v46 = vsel %vm880_vm6, %v1205_v48, %v1207_v57  ;;  %v1221_v33 = vsel %vm880_vm6, %v1207_v57, %v1209_v60 }
 0x573   : > { %v1256_v23 = vadd.f32 %v1220_v46, %v1112_v51  ;;  %v1257_v5 = vadd.f32 %v1221_v33, %v1113_v54 }
 0x575   : > { %1308 = vrot.lane.b32.xlu0 %v1256_v23, %s2703_s12  ;;  %v1638_v4 = vpop.permute.xlu0 %1637 }
 0x576   : > { %v1653_v26 = vsel %vm880_vm6, %v1638_v4, %v1640_v0 }
 0x579   : > { %1306 = vrot.lane.b32.xlu0 %v1255_v39, %s2703_s12  ;;  %v1642_v1 = vpop.permute.xlu0 %1641 }
 0x581   : > { %v596_v63 = vpop.permute.xlu0 %595 }
 0x585   : > { %2106 = vmax.xlane.f32.xlu1 %v2105_v41  ;;  %v708_v48 = vpop.permute.xlu0 %707 }
 0x589   : > { %v871_v44 = vpop.permute.xlu0 %870 }
 0x596   : > { %600 = vperm.xlu1 %2644, %v3691_v7   ;;  %v662_v7 = vmul.f32 %v3774_v29, %v3762_v20  ;;  %v1716_v29 = vmul.f32 %v3251_v40, %v1687_v15 }
 0x59a   : > { %709 = vrot.lane.b32.xlu1 %v659_v19, %s2701_s26 }
 0x59e   : > { %705 = vrot.lane.b32.xlu1 %v657_v53, %s2701_s26 }
 0x5a2   : > { %868 = vrot.lane.b32.xlu1 %v820_v34, %s2702_s29 }
 0x5a6   : > { %872 = vrot.lane.b32.xlu1 %v822_v9, %s2702_s29  ;;  %v616_v9 = vmul.f32 %v596_v63, %v3745_v45 }
 0x5aa   : > { %715 = vrot.lane.b32.xlu1 %v662_v7, %s2701_s26  ;;  %v617_v7 = vmul.f32 %v596_v63, %v3748_v17 }
 0x5ae   : > { %711 = vrot.lane.b32.xlu1 %v660_v2, %s2701_s26 }
 0x5b2   : > { %876 = vrot.lane.b32.xlu1 %v824_v43, %s2702_s29 }
 0x5b6   : > { %1302 = vrot.lane.b32.xlu1 %v1253_v8, %s2703_s12  ;;  %v1400_v8 = vmul.f32 0.0, %v3780_v13 }
 0x5b8   : > { %v1544_v25 = vadd.f32 %v1494_v37, %v1400_v8 }
 0x5ba   : > { %1300 = vrot.lane.b32.xlu1 %v3846_v56, %s2703_s12  ;;  %v1401_v56 = vmul.f32 %v3780_v13, %v3794_v42  ;;  %v1688_v10 = vadd.f32 %v1638_v4, %v1544_v25 }
 0x5bc   : > { %v1545_v47 = vadd.f32 %v1509_v38, %v1401_v56  ;;  %v1717_v36 = vmul.f32 %v3256_v14, %v1688_v10 }
 0x5be   : > { %1766 = vrot.lane.b32.xlu1 %v1716_v29, %s2704_s13  ;;  %v1689_v59 = vadd.f32 %v1653_v26, %v1545_v47  ;;  %v2314_v29 = vld [vmem:[%s4022_s6 + $0x8] sm:$0xff] }
 0x5c0   : > { %v1718_v49 = vmul.f32 %v3271_v24, %v1689_v59  ;;  %v1654_v24 = vsel %vm880_vm6, %v1640_v0, %v1642_v1  ;;  %v615_v0 = vmul.f32 0.0, %v596_v63 }
 0x5c1   : > { %v1690_v37 = vadd.f32 %v1654_v24, %v1546_v31 }
 0x5c2   : > { %1762 = vrot.lane.b32.xlu1 %v1714_v16, %s2704_s13 }
 0x5c3   : > { %v1719_v14 = vmul.f32 %v3251_v40, %v1690_v37  ;;  %v714_v40 = vpop.permute.xlu0 %713 }
 0x5c6   : > { %1310 = vrot.lane.b32.xlu1 %v1257_v5, %s2703_s12 }
 0x5c7   : > { %v1852_v28 = vpop.permute.xlu0 %1851 }
 0x5ca   : > { %1770 = vrot.lane.b32.xlu1 %v1718_v49, %s2704_s13 }
 0x5cb   : > { %v3943_v19 = vpop.permute.xlu0 %874 }
 0x5ce   : > { %1768 = vrot.lane.b32.xlu1 %v1717_v36, %s2704_s13 }
 0x5cf   : > { %v879_v2 = vpop.permute.xlu0 %878 }
 0x5d3   : > { %v2215_v11 = vpop.permute.xlu1 %2214  ;;  %v1305_v45 = vpop.permute.xlu0 %1304 }
 0x5d4   : > { %v2217_v15 = vsel %vm2104_vm13, %v2215_v11, 0.0 }
 0x5d5   : > { %2218 = vadd.xlane.f32.xlu0 %v2217_v15 }
 0x5d9   : > { %v1765_v26 = vpop.permute.xlu0 %1764 }
 0x5eb   : > { %1772 = vrot.lane.b32.xlu0 %v1719_v14, %s2704_s13  ;;  %v1857_v14 = vpop.permute.xlu0 %1856 }
 0x5ef   : > { %v1309_v63 = vpop.permute.xlu0 %1308 }
 0x612   : > { %v2107_v52 = vpop.xlane.xlu1 %2106 }
 0x613   : > { %v2108_v3 = vsub.f32 %v2103_v55, %v2107_v52 }
 0x615   : > { %v2109_v21 = vmul.f32 1.442695, %v2108_v3 }
 0x616   : > { %v3937_v51 = vpop.permute.xlu1 %600 }
 0x617   : > { %2655 = vpow2.f32 %v2109_v21  ;;  %v618_v3 = vmul.f32 0.0, %v3937_v51  ;;  %v619_v21 = vmul.f32 %v3937_v51, %v3794_v42 }
 0x61a   : > { %v710_v18 = vpop.permute.xlu1 %709 }
 0x61b   : > { %v727_v34 = vsel %vm717_vm5, %v708_v48, %v710_v18  ;;  %v762_v32 = vadd.f32 %v710_v18, %v617_v7 }
 0x61c   : > { %v761_v60 = vadd.f32 %v727_v34, %v616_v9 }
 0x61e   : > { %v706_v57 = vpop.permute.xlu1 %705 }
 0x61f   : > { %v726_v50 = vsel %vm717_vm5, %v706_v57, %v708_v48  ;;  %v1307_v57 = vpop.permute.xlu0 %1306 }
 0x620   : > { %v760_v17 = vadd.f32 %v726_v50, %v615_v0  ;;  %v1323_v0 = vsel %vm1312_vm9, %v1307_v57, %v1309_v63 }
 0x621   : > { %v3939_v13 = vpop.eup %2655 }
 0x622   : > { %v869_v46 = vpop.permute.xlu1 %868  ;;  %v2111_v23 = vsel %vm2104_vm13, %v3939_v13, 0.0 }
 0x623   : > { %2112 = vadd.xlane.f32.xlu0 %v2111_v23  ;;  %v889_v43 = vsel %vm880_vm6, %v869_v46, %v871_v44  ;;  %v923_v54 = vadd.f32 %v869_v46, %v760_v17  ;;  %v620_v46 = vmul.f32 %v3937_v51, %v3762_v20  ;;  %v2313_v17 = vld [vmem:[%s4022_s6] sm:$0xff] }
 0x624   : > { %v924_v4 = vadd.f32 %v889_v43, %v761_v60 }
 0x625   : > { %v952_v36 = vmul.f32 %v3478_v12, %v923_v54 }
 0x626   : > { %v873_v39 = vpop.permute.xlu1 %872  ;;  %v953_v33 = vmul.f32 %v3486_v22, %v924_v4 }
 0x627   : > { %v890_v61 = vsel %vm880_vm6, %v871_v44, %v873_v39 }
 0x628   : > { %v925_v38 = vadd.f32 %v890_v61, %v762_v32 }
 0x62a   : > { %v716_v41 = vpop.permute.xlu1 %715  ;;  %v954_v56 = vmul.f32 %v3464_v30, %v925_v38 }
 0x62b   : > { %v729_v52 = vsel %vm717_vm5, %v714_v40, %v716_v41 }
 0x62c   : > { %v1357_v59 = vadd.f32 %v1305_v45, %v954_v56  ;;  %v764_v23 = vadd.f32 %v729_v52, %v619_v21 }
 0x62e   : > { %v712_v55 = vpop.permute.xlu1 %711 }
 0x62f   : > { %v728_v18 = vsel %vm717_vm5, %v712_v55, %v714_v40 }
 0x630   : > { %v763_v34 = vadd.f32 %v728_v18, %v618_v3 }
 0x632   : > { %v877_v53 = vpop.permute.xlu1 %876  ;;  %v926_v40 = vadd.f32 %v3943_v19, %v763_v34 }
 0x633   : > { %v891_v44 = vsel %vm880_vm6, %v3943_v19, %v877_v53  ;;  %v892_v39 = vsel %vm880_vm6, %v877_v53, %v879_v2 }
 0x634   : > { %v927_v9 = vadd.f32 %v891_v44, %v764_v23 }
 0x636   : > { %v1303_v6 = vpop.permute.xlu1 %1302  ;;  %v956_v55 = vmul.f32 %v3486_v22, %v927_v9 }
 0x637   : > { %v1322_v16 = vsel %vm1312_vm9, %v1303_v6, %v1305_v45 }
 0x638   : > { %v1356_v47 = vadd.f32 %v1322_v16, %v953_v33 }
 0x639   : > { %2322 = vperm.xlu0 %2643, %v2314_v29  }
 0x63a   : > { %v1301_v8 = vpop.permute.xlu1 %1300 }
 0x63b   : > { %v1321_v49 = vsel %vm1312_vm9, %v1301_v8, %v1303_v6 }
 0x63c   : > { %v1355_v58 = vadd.f32 %v1321_v49, %v952_v36 }
 0x63e   : > { %v1767_v25 = vpop.permute.xlu1 %1766 }
 0x63f   : > { %v1784_v5 = vsel %vm1774_vm10, %v1765_v26, %v1767_v25  ;;  %v1819_v11 = vadd.f32 %v1767_v25, %v1357_v59 }
 0x640   : > { %v1818_v10 = vadd.f32 %v1784_v5, %v1356_v47 }
 0x641   : > { %v1873_v24 = vadd.f32 %v1852_v28, %v1819_v11 }
 0x642   : > { %v1872_v15 = vadd.f32 %v1852_v28, %v1818_v10  ;;  %v1763_v1 = vpop.permute.xlu1 %1762 }
 0x643   : > { %v1783_v62 = vsel %vm1774_vm10, %v1763_v1, %v1765_v26 }
 0x644   : > { %2121 = vrot.lane.b32.xlu1 %v1872_v15, %s2705_s16  ;;  %v1817_v31 = vadd.f32 %v1783_v62, %v1355_v58 }
 0x646   : > { %v1871_v37 = vadd.f32 %v1852_v28, %v1817_v31  ;;  %v1311_v48 = vpop.permute.xlu1 %1310  ;;  %v765_v28 = vadd.f32 %v716_v41, %v620_v46  ;;  %v955_v41 = vmul.f32 %v3478_v12, %v926_v40  ;;  %v2312_v31 = vld [vmem:[%s4021_s5 + $0x8] sm:$0xff] }
 0x647   : > { %v1324_v42 = vsel %vm1312_vm9, %v1309_v63, %v1311_v48 }
 0x648   : > { %2123 = vrot.lane.b32.xlu1 %v1873_v24, %s2705_s16  ;;  %v928_v7 = vadd.f32 %v892_v39, %v765_v28  ;;  %v1359_v32 = vadd.f32 %v1324_v42, %v956_v55  ;;  %v1358_v4 = vadd.f32 %v1323_v0, %v955_v41  ;;  %v2311_v24 = vld [vmem:[%s4021_s5] sm:$0xff] }
 0x64a   : > { %v1771_v43 = vpop.permute.xlu1 %1770  ;;  %v957_v60 = vmul.f32 %v3464_v30, %v928_v7 }
 0x64c   : > { %2119 = vrot.lane.b32.xlu1 %v1871_v37, %s2705_s16  ;;  %v1360_v51 = vadd.f32 %v1311_v48, %v957_v60 }
 0x64e   : > { %v1769_v53 = vpop.permute.xlu1 %1768 }
 0x64f   : > { %v1785_v19 = vsel %vm1774_vm10, %v1769_v53, %v1771_v43 }
 0x650   : > { %v1820_v30 = vadd.f32 %v1785_v19, %v1358_v4 }
 0x652   : > { %v1874_v38 = vadd.f32 %v1857_v14, %v1820_v30 }
 0x662   : > { %v2219_v61 = vpop.xlane.xlu0 %2218 }
 0x663   : > { %2657 = vrcp.f32 %v2219_v61 }
 0x666   : > { %v1773_v6 = vpop.permute.xlu0 %1772 }
 0x667   : > { %v1786_v20 = vsel %vm1774_vm10, %v1771_v43, %v1773_v6  ;;  %v1822_v29 = vadd.f32 %v1773_v6, %v1360_v51 }
 0x668   : > { %v1821_v2 = vadd.f32 %v1786_v20, %v1359_v32 }
 0x669   : > { %v1876_v22 = vadd.f32 %v1857_v14, %v1822_v29 }
 0x66a   : > { %v1875_v50 = vadd.f32 %v1857_v14, %v1821_v2 }
 0x66c   : > { %2230 = vrot.lane.b32.xlu1 %v1875_v50, %s2705_s16 }
 0x66d   : > { %v2658_v45 = vpop.eup %2657 }
 0x66e   : > { %v2221_v12 = vmul.f32 %v2658_v45, %v3859_v27 }
 0x670   : > { %2232 = vrot.lane.b32.xlu1 %v1876_v22, %s2705_s16 }
 0x674   : > { %2228 = vrot.lane.b32.xlu1 %v1874_v38, %s2705_s16 }
 0x678   : > { %2223 = vrot.lane.b32.xlu1 %v2221_v12, %s2706_s19 }
 0x67c   : > { %2317 = vperm.xlu1 %2644, %v2313_v17  }
 0x6b0   : > { %v2113_v8 = vpop.xlane.xlu0 %2112 }
 0x6b1   : > { %2659 = vrcp.f32 %v2113_v8 }
 0x6b6   : > { %v2122_v16 = vpop.permute.xlu1 %2121 }
 0x6b8   : > { %v2323_v21 = vpop.permute.xlu0 %2322 }
 0x6ba   : > { %v2124_v56 = vpop.permute.xlu1 %2123 }
 0x6bb   : > { %v2126_v33 = vsel %vm1901_vm11, %v2122_v16, %v2124_v56  ;;  %v2660_v26 = vpop.eup %2659 }
 0x6bc   : > { %2132 = vmatprep.subr.mxu1 %v2126_v33  ;;  %v2115_v47 = vmul.f32 %v2660_v26, %v3939_v13 }
 0x6be   : > { %v2120_v54 = vpop.permute.xlu1 %2119 }
 0x6bf   : > { %v2125_v27 = vsel %vm1901_vm11, %v2120_v54, %v2122_v16 }
 0x6c0   : > { %2133 = vmatpush1.msra.mxu1 %v2125_v27 }
 0x6c1   : > { %2500 = vmatmul.mubr.msk.f32.vlgmr.msra.gmra.mrb[4].mxu1 %vm2104_vm13, %v2115_v47 }
 0x6c2   : > { %2304 = vmatprep.mubr.f32.mxu1 %v4069_v35 }
 0x6de   : > { %v2231_v25 = vpop.permute.xlu1 %2230 }
 0x6e2   : > { %v2233_v5 = vpop.permute.xlu1 %2232 }
 0x6e3   : > { %v2235_v59 = vsel %vm1901_vm11, %v2231_v25, %v2233_v5 }
 0x6e4   : > { %2240 = vmatprep.subr.mxu1 %v2235_v59 }
 0x6e6   : > { %v2229_v10 = vpop.permute.xlu1 %2228 }
 0x6e7   : > { %v2234_v49 = vsel %vm1901_vm11, %v2229_v10, %v2231_v25 }
 0x6e8   : > { %2241 = vmatpush1.msra.mxu1 %v2234_v49 }
 0x6ea   : > { %v2224_v36 = vpop.permute.xlu1 %2223 }
 0x6eb   : > { %2502 = vmatmul.mubr.msk.f32.vlgmr.msra.gmra.mrb[6].mxu1 %vm2104_vm13, %v2224_v36 }
 0x6ec   : > { %2395 = vmatprep.mubr.f32.mxu1 %v4069_v35 }
 0x6fb   : > { %v2318_v37 = vpop.permute.xlu1 %2317 }
 0x794   : > { %v2198_v13 = vpop.f32.mrb[4].mxu1 }
 0x795   : > { %v2200_v11 = vpop.f32.mrb[5].mxu1 }
 0x7be   : > { %v2306_v15 = vpop.f32.mrb[6].mxu1 }
 0x7bf   : > { %v2519_v1 = vpack.c.bf16 %v2306_v15, %v2198_v13  ;;  %v2308_v62 = vpop.f32.mrb[7].mxu1 }
 0x7c0   : > { %v2517_v58 = vpack.c.bf16 %v2308_v62, %v2200_v11 }
 0x7c2   : > { %2518 = vmatprep.subr.bf16.mxu1 %v2517_v58 }
 0x7c3   : > { %2520 = vmatpush1.bf16.msra.mxu1 %v2519_v1 }
 0x7c6   : > { %2503 = vmatmul.mubr.msk.f32.vlgmr.msra.gmra.mrb[8].mxu1 %vm366_vm0, %v2311_v24 }
 0x7c7   : > { %2401 = vmatprep.mubr.f32.mxu1 %v4069_v35 }
 0x7ca   : > { %2504 = vmatmul.mubr.msk.f32.gmra.mrb[10].mxu1 %vm366_vm0, %v2312_v31 }
 0x899   : > { %v2397_v14 = vpop.f32.mrb[8].mxu1 }
 0x89a   : > { %v2398_v63 = vadd.f32 %v2397_v14, %v2318_v37  ;;  %v2399_v52 = vpop.f32.mrb[9].mxu1 }
 0x89b   : > { %v2400_v3 = vadd.f32 %v2399_v52, %v2318_v37 }
 0x89c   : > { %2408 = vst [vmem:[%s319_s10] sm:$0xff] %v2398_v63 }
 0x89d   : > { %2409 = vst [vmem:[%s319_s10 + $0x8] sm:$0xff] %v2400_v3  ;;  %v2403_v35 = vpop.f32.mrb[10].mxu1 }
 0x89e   : > { %v2404_v48 = vadd.f32 %v2403_v35, %v2323_v21  ;;  %v2405_v18 = vpop.f32.mrb[11].mxu1 }
 0x89f   : > { %v2406_v44 = vadd.f32 %v2405_v18, %v2323_v21 }
 0x8a0   : > { %2410 = vst [vmem:[%s319_s10 + $0x10] sm:$0xff] %v2404_v48 }
 0x8a1   : > { %2411 = vst [vmem:[%s319_s10 + $0x18] sm:$0xff] %v2406_v44 }
 0x8a2 PF: > { %s19_s27 = sadd.s32 1, %s2686_s27  }
 0x8a3   : > { %p16_p1 = scmp.ge.s32.totalorder %s19_s27, 4  }
 0x8a5   :  { %18 = sbr.rel (!%p16_p1) target bundleno = 1 (0x1), region = 87 }
 0x8ac   :  { %2433 = vsyncpa [#allocation4], 1 }
 0x8ad   :  { %2435 = vsyncpa [#allocation4 + $0x1], 1 }

</bundles_post_ra>
